<compile_context>
chip_gen: v7x
topology: tpu7x:2x2x1
jax: 0.10.0
libtpu: 0.0.40
codegen_flags: <defaults>
</compile_context>

<pallas_src>
import functools
import math

import jax
import jax.numpy as jnp
from jax import lax
from jax.experimental import pallas as pl
from jax.experimental.pallas import tpu as pltpu

_TQ_TILE = 512                    # query-tile target (K/V HBM traffic ~ Sp/tq)
_TKV_TILE = 256                   # key/value-tile target (asymmetric: kv buffers stay small)
_TM_TILE = 512                    # M-tile target for the projections
_VMEM_LIMIT = 48 * 1024 * 1024    # scoped-VMEM limit: <= v7x 64 MiB physical, raises v5e/v6e defaults


def _round_up(x, m):
    return (x + m - 1) // m * m


# ----------------------------------------------------------------------------
# Fused QKV projection: weight fully VMEM-resident, grid over M only,
# in-kernel f32 -> bf16 cast of x, single K=d_model MXU matmul per step.
# ----------------------------------------------------------------------------
def _qkv_kernel(x_ref, w_ref, b_ref, q_ref, k_ref, v_ref):
    d = q_ref.shape[-1]
    x = x_ref[...].astype(jnp.bfloat16)           # cast hides under the MXU
    y = jnp.dot(x, w_ref[...], preferred_element_type=jnp.float32) + b_ref[...]
    q_ref[...] = y[:, :d].astype(q_ref.dtype)
    k_ref[...] = y[:, d:2 * d].astype(k_ref.dtype)
    v_ref[...] = y[:, 2 * d:].astype(v_ref.dtype)


def qkv_projection(x2d, wqkv_t, bqkv, *, d_model, tm):
    """x2d: (M, K) f32, wqkv_t: (K, 3*d_model) bf16, bqkv: (1, 3*d_model) f32."""
    M, K = x2d.shape
    N3 = wqkv_t.shape[1]
    assert M % tm == 0
    # NOTE: full-weight residency assumes K*N3*2 bytes fits the VMEM budget
    # (true for d_model up to ~2k). TODO(synk): fall back to K-tiling beyond that.
    out_sd = jax.ShapeDtypeStruct((M, d_model), jnp.bfloat16)
    flops = 2 * M * N3 * K
    bytes_accessed = M * K * 4 + K * N3 * 2 + N3 * 4 + 3 * M * d_model * 2

    return pl.pallas_call(
        _qkv_kernel,
        out_shape=(out_sd, out_sd, out_sd),
        grid=(M // tm,),
        in_specs=[
            pl.BlockSpec((tm, K), lambda i: (i, 0)),
            pl.BlockSpec((K, N3), lambda i: (0, 0)),      # full weight, constant index map
            pl.BlockSpec((1, N3), lambda i: (0, 0)),
        ],
        out_specs=(
            pl.BlockSpec((tm, d_model), lambda i: (i, 0)),
            pl.BlockSpec((tm, d_model), lambda i: (i, 0)),
            pl.BlockSpec((tm, d_model), lambda i: (i, 0)),
        ),
        compiler_params=pltpu.CompilerParams(
            dimension_semantics=("parallel",),
            vmem_limit_bytes=_VMEM_LIMIT),
        cost_estimate=pl.CostEstimate(flops=flops, transcendentals=0,
                                      bytes_accessed=bytes_accessed),
    )(x2d, wqkv_t, bqkv)


# ----------------------------------------------------------------------------
# Output projection: weight fully VMEM-resident, grid over M only.
# ----------------------------------------------------------------------------
def _linear_kernel(x_ref, w_ref, b_ref, o_ref):
    y = jnp.dot(x_ref[...], w_ref[...], preferred_element_type=jnp.float32) + b_ref[...]
    o_ref[...] = y.astype(o_ref.dtype)


def linear(x2d, w_t, b, *, out_dtype, tm):
    """x2d: (M, K) bf16, w_t: (K, N) bf16 (pre-transposed), b: (1, N) f32."""
    M, K = x2d.shape
    _, N = w_t.shape
    assert M % tm == 0
    flops = 2 * M * N * K
    bytes_accessed = M * K * 2 + K * N * 2 + N * 4 + M * N * 4

    return pl.pallas_call(
        _linear_kernel,
        out_shape=jax.ShapeDtypeStruct((M, N), out_dtype),
        grid=(M // tm,),
        in_specs=[
            pl.BlockSpec((tm, K), lambda i: (i, 0)),
            pl.BlockSpec((K, N), lambda i: (0, 0)),       # full weight, constant index map
            pl.BlockSpec((1, N), lambda i: (0, 0)),
        ],
        out_specs=pl.BlockSpec((tm, N), lambda i: (i, 0)),
        compiler_params=pltpu.CompilerParams(
            dimension_semantics=("parallel",),
            vmem_limit_bytes=_VMEM_LIMIT),
        cost_estimate=pl.CostEstimate(flops=flops, transcendentals=0,
                                      bytes_accessed=bytes_accessed),
    )(x2d, w_t, b)


# ----------------------------------------------------------------------------
# Flash-style multi-head attention: grid (B, nq, nkv), all heads per step,
# masked-KV-tile skipping via scalar-prefetched per-(b, ki) flag in SMEM.
# ----------------------------------------------------------------------------
def _flash_attn_kernel(any_keep_ref, keep_ref, q_ref, k_ref, v_ref, o_ref,
                       m_sc, l_sc, acc_sc, *, num_heads, d_k, scale):
    b = pl.program_id(0)
    ki = pl.program_id(2)

    @pl.when(ki == 0)
    def _init():
        m_sc[...] = jnp.full_like(m_sc, -jnp.inf)
        l_sc[...] = jnp.zeros_like(l_sc)
        acc_sc[...] = jnp.zeros_like(acc_sc)

    # Skip KV tiles that are entirely padding / masked-out (one SMEM scalar read).
    @pl.when(any_keep_ref[b, ki] != 0)
    def _compute():
        keep = keep_ref[...]                     # (1, tkv) f32: 1 = attend, 0 = masked
        bias = (keep - 1.0) * 1000000000.0       # additive 0 / -1e9 bias, built once

        # TODO(synk): when d_k % 128 != 0 these per-head lane slices are not
        # 128-lane aligned; a fully aligned variant needs a (B, H, S, d_k)
        # layout (head-split transpose), which we avoid to keep q/k/v lane-dense.
        for hh in range(num_heads):
            lo = hh * d_k
            hi = lo + d_k
            q_h = q_ref[:, lo:hi]                # (tq, d_k)  bf16
            k_h = k_ref[:, lo:hi]                # (tkv, d_k) bf16
            v_h = v_ref[:, lo:hi]                # (tkv, d_k) bf16

            # q @ k^T via dot_general (no explicit transpose), f32 accumulation.
            s = lax.dot_general(q_h, k_h, (((1,), (1,)), ((), ())),
                                preferred_element_type=jnp.float32) * scale
            s = s + bias

            m_prev = m_sc[:, hh:hh + 1]          # (tq, 1)
            l_prev = l_sc[:, hh:hh + 1]
            a_prev = acc_sc[:, lo:hi]            # (tq, d_k) f32

            m_new = jnp.maximum(m_prev, jnp.max(s, axis=-1, keepdims=True))
            alpha = jnp.exp(m_prev - m_new)
            # post-softmax zeroing of masked keys == masked_fill(mask == 0, 0)
            p = jnp.exp(s - m_new) * keep

            l_sc[:, hh:hh + 1] = alpha * l_prev + jnp.sum(p, axis=-1, keepdims=True)
            acc_sc[:, lo:hi] = alpha * a_prev + jnp.dot(
                p.astype(v_h.dtype), v_h, preferred_element_type=jnp.float32)
            m_sc[:, hh:hh + 1] = m_new

    @pl.when(ki == pl.num_programs(2) - 1)
    def _finalize():
        l = l_sc[...]                                          # (tq, H)
        # guard fully-masked rows (reference yields 0 there as well)
        l_inv = pl.reciprocal(jnp.where(l == 0.0, 1.0, l), approx=True)
        for hh in range(num_heads):
            lo = hh * d_k
            hi = lo + d_k
            acc_sc[:, lo:hi] = acc_sc[:, lo:hi] * l_inv[:, hh:hh + 1]
        # single lane-dense (tq, d_model) store
        o_ref[...] = acc_sc[...].astype(o_ref.dtype)


def flash_attention(q, k, v, keep, any_keep, *, num_heads, tq, tkv):
    """q,k,v: (B, Sp, d_model) bf16; keep: (B, 1, Sp) f32; any_keep: (B, Sp//tkv) int32."""
    B, Sp, d_model = q.shape
    d_k = d_model // num_heads
    nq = Sp // tq
    nkv = Sp // tkv
    scale = 1.0 / math.sqrt(d_k)

    kernel = functools.partial(_flash_attn_kernel, num_heads=num_heads,
                               d_k=d_k, scale=scale)
    flops = 4 * B * Sp * Sp * d_model
    transcendentals = B * num_heads * Sp * Sp
    bytes_accessed = (B * Sp * d_model * 2) * (2 + 2 * nq) + B * Sp * 4

    return pl.pallas_call(
        kernel,
        out_shape=jax.ShapeDtypeStruct((B, Sp, d_model), jnp.bfloat16),
        grid_spec=pltpu.PrefetchScalarGridSpec(
            num_scalar_prefetch=1,
            grid=(B, nq, nkv),
            in_specs=[
                pl.BlockSpec((None, 1, tkv), lambda b, qi, ki, ak: (b, 0, ki)),        # keep mask
                pl.BlockSpec((None, tq, d_model), lambda b, qi, ki, ak: (b, qi, 0)),   # q
                pl.BlockSpec((None, tkv, d_model), lambda b, qi, ki, ak: (b, ki, 0)),  # k
                pl.BlockSpec((None, tkv, d_model), lambda b, qi, ki, ak: (b, ki, 0)),  # v
            ],
            out_specs=pl.BlockSpec((None, tq, d_model), lambda b, qi, ki, ak: (b, qi, 0)),
            scratch_shapes=[
                pltpu.VMEM((tq, num_heads), jnp.float32),   # running max per head
                pltpu.VMEM((tq, num_heads), jnp.float32),   # running denom per head
                pltpu.VMEM((tq, d_model), jnp.float32),     # running numerator (all heads)
            ]),
        compiler_params=pltpu.CompilerParams(
            dimension_semantics=("parallel", "parallel", "arbitrary"),
            vmem_limit_bytes=_VMEM_LIMIT),
        cost_estimate=pl.CostEstimate(flops=flops, transcendentals=transcendentals,
                                      bytes_accessed=bytes_accessed),
    )(any_keep, keep, q, k, v)


# ----------------------------------------------------------------------------
# Module wrapper: MultiHeadedSelfAttention.forward (eval mode)
# ----------------------------------------------------------------------------
def prepare_params(params):
    """One-time weight prep (transpose + concat + bf16 cast), outside the jitted forward."""
    d_model = params["wq"].shape[0]
    wqkv_t = jnp.concatenate(
        [params["wq"].T, params["wk"].T, params["wv"].T], axis=1).astype(jnp.bfloat16)
    bqkv = jnp.concatenate(
        [params["bq"], params["bk"], params["bv"]]).reshape(1, 3 * d_model).astype(jnp.float32)
    wo_t = params["wo"].T.astype(jnp.bfloat16)
    bo = params["bo"].reshape(1, d_model).astype(jnp.float32)
    return {"wqkv_t": wqkv_t, "bqkv": bqkv, "wo_t": wo_t, "bo": bo}


def _seq_tiles(S):
    s16 = _round_up(S, 16)            # bf16 sublane packing: 16-row granularity
    if s16 <= _TQ_TILE:
        return s16, s16, s16          # tq, tkv, Sp (single tile each way)
    Sp = _round_up(S, _TQ_TILE)       # multiple of both _TQ_TILE and _TKV_TILE
    return _TQ_TILE, _TKV_TILE, Sp


def multi_headed_self_attention(prepared, x, mask, h):
    """x: (B, S, d_model) f32; mask: (B, 1, S) int (1 = keep, 0 = masked)."""
    B, S, d_model = x.shape
    assert d_model % h == 0
    # TODO(synk): attention-prob dropout (p=0.1 in training) omitted — eval/deterministic kernel.

    tq, tkv, Sp = _seq_tiles(S)
    if Sp != S:
        x = jnp.pad(x, ((0, 0), (0, Sp - S), (0, 0)))
    keep = mask.reshape(B, 1, S).astype(jnp.float32)
    if Sp != S:
        keep = jnp.pad(keep, ((0, 0), (0, 0), (0, Sp - S)))
    nkv = Sp // tkv
    # per-(batch, kv-tile) "anything to attend to" flag -> masked-tile skipping
    any_keep = (jnp.max(keep.reshape(B, nkv, tkv), axis=-1) > 0.0).astype(jnp.int32)

    tm = Sp if Sp <= _TM_TILE else _TM_TILE       # divides B*Sp
    x2d = x.reshape(B * Sp, d_model)              # stays f32; bf16 cast happens in-kernel

    q2d, k2d, v2d = qkv_projection(x2d, prepared["wqkv_t"], prepared["bqkv"],
                                   d_model=d_model, tm=tm)

    # free reshapes only — no head split/merge transposes
    q = q2d.reshape(B, Sp, d_model)
    k = k2d.reshape(B, Sp, d_model)
    v = v2d.reshape(B, Sp, d_model)

    o = flash_attention(q, k, v, keep, any_keep, num_heads=h, tq=tq, tkv=tkv)
    o2d = o.reshape(B * Sp, d_model)

    y = linear(o2d, prepared["wo_t"], prepared["bo"], out_dtype=jnp.float32, tm=tm)
    y = y.reshape(B, Sp, d_model)
    return y[:, :S, :] if Sp != S else y


# ----------------------------------------------------------------------------
# Pure-JAX float32 reference (matches the PyTorch module, eval mode)
# ----------------------------------------------------------------------------
def reference_forward(params, x, mask, h):
    B, S, d_model = x.shape
    d_k = d_model // h

    def lin(t, w, b):
        return jnp.einsum("bsd,od->bso", t, w) + b

    q = lin(x, params["wq"], params["bq"]).reshape(B, S, h, d_k).transpose(0, 2, 1, 3)
    k = lin(x, params["wk"], params["bk"]).reshape(B, S, h, d_k).transpose(0, 2, 1, 3)
    v = lin(x, params["wv"], params["bv"]).reshape(B, S, h, d_k).transpose(0, 2, 1, 3)
    m = mask[:, :, None, :]                              # (B, 1, 1, S)
    scores = jnp.einsum("bhqd,bhkd->bhqk", q, k) / math.sqrt(d_k)
    scores = jnp.where(m == 0, -1000000000.0, scores)
    p = jax.nn.softmax(scores, axis=-1)
    p = jnp.where(m == 0, 0.0, p)
    o = jnp.einsum("bhqk,bhkd->bhqd", p, v)
    o = o.transpose(0, 2, 1, 3).reshape(B, S, d_model)
    return jnp.einsum("bsd,od->bso", o, params["wo"]) + params["bo"]


def init_params(key, d_model):
    ks = jax.random.split(key, 8)
    scale = 1.0 / math.sqrt(d_model)

    def w(k):
        return (jax.random.uniform(k, (d_model, d_model), jnp.float32) * 2 - 1) * scale

    def b(k):
        return (jax.random.uniform(k, (d_model,), jnp.float32) * 2 - 1) * scale

    return {
        "wq": w(ks[0]), "bq": b(ks[1]),
        "wk": w(ks[2]), "bk": b(ks[3]),
        "wv": w(ks[4]), "bv": b(ks[5]),
        "wo": w(ks[6]), "bo": b(ks[7]),
    }


if __name__ == "__main__":
    B, S, d_model, h = 2, 8, 32, 4

    key = jax.random.PRNGKey(0)
    k_param, k_x = jax.random.split(key)
    params = init_params(k_param, d_model)
    prepared = prepare_params(params)          # one-time weight prep, outside jit

    x = jax.random.normal(k_x, (B, S, d_model), dtype=jnp.float32)
    # key-padding mask: last 2 tokens of batch 1 masked out
    mask = jnp.ones((B, 1, S), dtype=jnp.int32)
    mask = mask.at[1, 0, -2:].set(0)

    fwd = jax.jit(functools.partial(multi_headed_self_attention, h=h))
    out = fwd(prepared, x, mask)
    jax.block_until_ready(out)
    assert out.shape == (B, S, d_model)

    ref = reference_forward(params, x, mask, h)
    assert jnp.allclose(out, ref, atol=5e-2, rtol=5e-2), (
        f"max abs err {float(jnp.max(jnp.abs(out - ref)))}")
    print("KERNEL_OK")
</pallas_src>

<mosaic_0001>
module attributes {stable_mosaic.version = 11 : i64} {
  func.func @_qkv_kernel(%arg0: i32, %arg1: memref<16x32xf32, #tpu.memory_space<vmem>>, %arg2: memref<32x96xbf16, #tpu.memory_space<vmem>>, %arg3: memref<1x96xf32, #tpu.memory_space<vmem>>, %arg4: memref<16x32xbf16, #tpu.memory_space<vmem>>, %arg5: memref<16x32xbf16, #tpu.memory_space<vmem>>, %arg6: memref<16x32xbf16, #tpu.memory_space<vmem>>) attributes {dimension_semantics = [#tpu.dimension_semantics<parallel>], iteration_bounds = array<i64: 2>, scalar_prefetch = 0 : i64, scratch_operands = 0 : i64, tpu.core_type = #tpu.core_type<tc>, window_params = [{transform_indices = @transform_0, window_bounds = array<i64: 16, 32>}, {pipeline_mode = #tpu.pipeline_mode<synchronous>, transform_indices = @transform_1, window_bounds = array<i64: 32, 96>}, {pipeline_mode = #tpu.pipeline_mode<synchronous>, transform_indices = @transform_2, window_bounds = array<i64: 1, 96>}, {transform_indices = @transform_3, window_bounds = array<i64: 16, 32>}, {transform_indices = @transform_4, window_bounds = array<i64: 16, 32>}, {transform_indices = @transform_5, window_bounds = array<i64: 16, 32>}]} {
    %c0 = arith.constant 0 : index
    %c0_0 = arith.constant 0 : index
    %0 = vector.load %arg1[%c0, %c0_0] : memref<16x32xf32, #tpu.memory_space<vmem>>, vector<16x32xf32>
    %1 = arith.truncf %0 : vector<16x32xf32> to vector<16x32xbf16>
    %c0_1 = arith.constant 0 : index
    %c0_2 = arith.constant 0 : index
    %2 = vector.load %arg2[%c0_1, %c0_2] : memref<32x96xbf16, #tpu.memory_space<vmem>>, vector<32x96xbf16>
    %cst = arith.constant dense<0.000000e+00> : vector<16x96xf32>
    %3 = tpu.matmul %1, %2, %cst {dimension_numbers = #tpu.dot_dimension_numbers<[1], [0], [0], [1], [0, 0, 1, 1], [], []>} : vector<16x32xbf16>, vector<32x96xbf16>, vector<16x96xf32> -> vector<16x96xf32>
    %c0_3 = arith.constant 0 : index
    %c0_4 = arith.constant 0 : index
    %4 = vector.load %arg3[%c0_3, %c0_4] : memref<1x96xf32, #tpu.memory_space<vmem>>, vector<1x96xf32>
    %5 = vector.broadcast %4 : vector<1x96xf32> to vector<16x96xf32>
    %6 = arith.addf %3, %5 : vector<16x96xf32>
    %7 = vector.extract_strided_slice %6 {offsets = [0, 0], sizes = [16, 32], strides = [1, 1]} : vector<16x96xf32> to vector<16x32xf32>
    %8 = arith.truncf %7 : vector<16x32xf32> to vector<16x32xbf16>
    %c0_5 = arith.constant 0 : index
    %c0_6 = arith.constant 0 : index
    %9 = vector.load %arg4[%c0_5, %c0_6] : memref<16x32xbf16, #tpu.memory_space<vmem>>, vector<16x32xbf16>
    tpu.vector_store %arg4[%c0_5, %c0_6], %8 {strides = array<i32>} : memref<16x32xbf16, #tpu.memory_space<vmem>>, vector<16x32xbf16>,
    %10 = vector.extract_strided_slice %6 {offsets = [0, 32], sizes = [16, 32], strides = [1, 1]} : vector<16x96xf32> to vector<16x32xf32>
    %11 = arith.truncf %10 : vector<16x32xf32> to vector<16x32xbf16>
    %c0_7 = arith.constant 0 : index
    %c0_8 = arith.constant 0 : index
    %12 = vector.load %arg5[%c0_7, %c0_8] : memref<16x32xbf16, #tpu.memory_space<vmem>>, vector<16x32xbf16>
    tpu.vector_store %arg5[%c0_7, %c0_8], %11 {strides = array<i32>} : memref<16x32xbf16, #tpu.memory_space<vmem>>, vector<16x32xbf16>,
    %13 = vector.extract_strided_slice %6 {offsets = [0, 64], sizes = [16, 32], strides = [1, 1]} : vector<16x96xf32> to vector<16x32xf32>
    %14 = arith.truncf %13 : vector<16x32xf32> to vector<16x32xbf16>
    %c0_9 = arith.constant 0 : index
    %c0_10 = arith.constant 0 : index
    %15 = vector.load %arg6[%c0_9, %c0_10] : memref<16x32xbf16, #tpu.memory_space<vmem>>, vector<16x32xbf16>
    tpu.vector_store %arg6[%c0_9, %c0_10], %14 {strides = array<i32>} : memref<16x32xbf16, #tpu.memory_space<vmem>>, vector<16x32xbf16>,
    return
  }
  func.func @transform_0(%arg0: i32) -> (i32, i32) {
    %c0_i32 = arith.constant 0 : i32
    %c0_i32_0 = arith.constant 0 : i32
    return %arg0, %c0_i32 : i32, i32
  }
  func.func @transform_1(%arg0: i32) -> (i32, i32) {
    %c0_i32 = arith.constant 0 : i32
    %c0_i32_0 = arith.constant 0 : i32
    %c0_i32_1 = arith.constant 0 : i32
    return %c0_i32, %c0_i32_0 : i32, i32
  }
  func.func @transform_2(%arg0: i32) -> (i32, i32) {
    %c0_i32 = arith.constant 0 : i32
    %c0_i32_0 = arith.constant 0 : i32
    %c0_i32_1 = arith.constant 0 : i32
    return %c0_i32, %c0_i32_0 : i32, i32
  }
  func.func @transform_3(%arg0: i32) -> (i32, i32) {
    %c0_i32 = arith.constant 0 : i32
    %c0_i32_0 = arith.constant 0 : i32
    return %arg0, %c0_i32 : i32, i32
  }
  func.func @transform_4(%arg0: i32) -> (i32, i32) {
    %c0_i32 = arith.constant 0 : i32
    %c0_i32_0 = arith.constant 0 : i32
    return %arg0, %c0_i32 : i32, i32
  }
  func.func @transform_5(%arg0: i32) -> (i32, i32) {
    %c0_i32 = arith.constant 0 : i32
    %c0_i32_0 = arith.constant 0 : i32
    return %arg0, %c0_i32 : i32, i32
  }
}

module attributes {stable_mosaic.version = 11 : i64} {
  func.func @_linear_kernel(%arg0: i32, %arg1: memref<16x32xbf16, #tpu.memory_space<vmem>>, %arg2: memref<32x32xbf16, #tpu.memory_space<vmem>>, %arg3: memref<1x32xf32, #tpu.memory_space<vmem>>, %arg4: memref<16x32xf32, #tpu.memory_space<vmem>>) attributes {dimension_semantics = [#tpu.dimension_semantics<parallel>], iteration_bounds = array<i64: 2>, scalar_prefetch = 0 : i64, scratch_operands = 0 : i64, tpu.core_type = #tpu.core_type<tc>, window_params = [{transform_indices = @transform_0, window_bounds = array<i64: 16, 32>}, {pipeline_mode = #tpu.pipeline_mode<synchronous>, transform_indices = @transform_1, window_bounds = array<i64: 32, 32>}, {pipeline_mode = #tpu.pipeline_mode<synchronous>, transform_indices = @transform_2, window_bounds = array<i64: 1, 32>}, {transform_indices = @transform_3, window_bounds = array<i64: 16, 32>}]} {
    %c0 = arith.constant 0 : index
    %c0_0 = arith.constant 0 : index
    %0 = vector.load %arg1[%c0, %c0_0] : memref<16x32xbf16, #tpu.memory_space<vmem>>, vector<16x32xbf16>
    %c0_1 = arith.constant 0 : index
    %c0_2 = arith.constant 0 : index
    %1 = vector.load %arg2[%c0_1, %c0_2] : memref<32x32xbf16, #tpu.memory_space<vmem>>, vector<32x32xbf16>
    %cst = arith.constant dense<0.000000e+00> : vector<16x32xf32>
    %2 = tpu.matmul %0, %1, %cst {dimension_numbers = #tpu.dot_dimension_numbers<[1], [0], [0], [1], [0, 0, 1, 1], [], []>} : vector<16x32xbf16>, vector<32x32xbf16>, vector<16x32xf32> -> vector<16x32xf32>
    %c0_3 = arith.constant 0 : index
    %c0_4 = arith.constant 0 : index
    %3 = vector.load %arg3[%c0_3, %c0_4] : memref<1x32xf32, #tpu.memory_space<vmem>>, vector<1x32xf32>
    %4 = vector.broadcast %3 : vector<1x32xf32> to vector<16x32xf32>
    %5 = arith.addf %2, %4 : vector<16x32xf32>
    %c0_5 = arith.constant 0 : index
    %c0_6 = arith.constant 0 : index
    %6 = vector.load %arg4[%c0_5, %c0_6] : memref<16x32xf32, #tpu.memory_space<vmem>>, vector<16x32xf32>
    tpu.vector_store %arg4[%c0_5, %c0_6], %5 {strides = array<i32>} : memref<16x32xf32, #tpu.memory_space<vmem>>, vector<16x32xf32>,
    return
  }
  func.func @transform_0(%arg0: i32) -> (i32, i32) {
    %c0_i32 = arith.constant 0 : i32
    %c0_i32_0 = arith.constant 0 : i32
    return %arg0, %c0_i32 : i32, i32
  }
  func.func @transform_1(%arg0: i32) -> (i32, i32) {
    %c0_i32 = arith.constant 0 : i32
    %c0_i32_0 = arith.constant 0 : i32
    %c0_i32_1 = arith.constant 0 : i32
    return %c0_i32, %c0_i32_0 : i32, i32
  }
  func.func @transform_2(%arg0: i32) -> (i32, i32) {
    %c0_i32 = arith.constant 0 : i32
    %c0_i32_0 = arith.constant 0 : i32
    %c0_i32_1 = arith.constant 0 : i32
    return %c0_i32, %c0_i32_0 : i32, i32
  }
  func.func @transform_3(%arg0: i32) -> (i32, i32) {
    %c0_i32 = arith.constant 0 : i32
    %c0_i32_0 = arith.constant 0 : i32
    return %arg0, %c0_i32 : i32, i32
  }
}

module attributes {stable_mosaic.version = 11 : i64} {
  func.func @_flash_attn_kernel(%arg0: i32, %arg1: i32, %arg2: i32, %arg3: memref<2x1xi32, #tpu.memory_space<smem>>, %arg4: memref<1x1x16xf32, #tpu.memory_space<vmem>>, %arg5: memref<1x16x32xbf16, #tpu.memory_space<vmem>>, %arg6: memref<1x16x32xbf16, #tpu.memory_space<vmem>>, %arg7: memref<1x16x32xbf16, #tpu.memory_space<vmem>>, %arg8: memref<1x16x32xbf16, #tpu.memory_space<vmem>>, %arg9: memref<16x4xf32, #tpu.memory_space<vmem>>, %arg10: memref<16x4xf32, #tpu.memory_space<vmem>>, %arg11: memref<16x32xf32, #tpu.memory_space<vmem>>) attributes {dimension_semantics = [#tpu.dimension_semantics<parallel>, #tpu.dimension_semantics<parallel>, #tpu.dimension_semantics<arbitrary>], iteration_bounds = array<i64: 2, 1, 1>, scalar_prefetch = 1 : i64, scratch_operands = 3 : i64, tpu.core_type = #tpu.core_type<tc>, window_params = [{transform_indices = @transform_0, window_bounds = array<i64: 1, 1, 16>}, {transform_indices = @transform_1, window_bounds = array<i64: 1, 16, 32>}, {transform_indices = @transform_2, window_bounds = array<i64: 1, 16, 32>}, {transform_indices = @transform_3, window_bounds = array<i64: 1, 16, 32>}, {transform_indices = @transform_4, window_bounds = array<i64: 1, 16, 32>}]} {
    %c0_i32 = arith.constant 0 : i32
    %0 = arith.cmpi eq, %arg2, %c0_i32 : i32
    %1 = arith.extui %0 : i1 to i32
    %c0_i32_0 = arith.constant 0 : i32
    %2 = arith.cmpi ne, %1, %c0_i32_0 : i32
    scf.if %2 {
      %cst = arith.constant 0xFF800000 : f32
      %12 = vector.broadcast %cst : f32 to vector<16x4xf32>
      %c0 = arith.constant 0 : index
      %c0_5 = arith.constant 0 : index
      %13 = vector.load %arg9[%c0, %c0_5] : memref<16x4xf32, #tpu.memory_space<vmem>>, vector<16x4xf32>
      tpu.vector_store %arg9[%c0, %c0_5], %12 {strides = array<i32>} : memref<16x4xf32, #tpu.memory_space<vmem>>, vector<16x4xf32>,
      %cst_6 = arith.constant 0.000000e+00 : f32
      %14 = vector.broadcast %cst_6 : f32 to vector<16x4xf32>
      %c0_7 = arith.constant 0 : index
      %c0_8 = arith.constant 0 : index
      %15 = vector.load %arg10[%c0_7, %c0_8] : memref<16x4xf32, #tpu.memory_space<vmem>>, vector<16x4xf32>
      tpu.vector_store %arg10[%c0_7, %c0_8], %14 {strides = array<i32>} : memref<16x4xf32, #tpu.memory_space<vmem>>, vector<16x4xf32>,
      %cst_9 = arith.constant 0.000000e+00 : f32
      %16 = vector.broadcast %cst_9 : f32 to vector<16x32xf32>
      %c0_10 = arith.constant 0 : index
      %c0_11 = arith.constant 0 : index
      %17 = vector.load %arg11[%c0_10, %c0_11] : memref<16x32xf32, #tpu.memory_space<vmem>>, vector<16x32xf32>
      tpu.vector_store %arg11[%c0_10, %c0_11], %16 {strides = array<i32>} : memref<16x32xf32, #tpu.memory_space<vmem>>, vector<16x32xf32>,
    } else {
    }
    %3 = arith.index_cast %arg0 : i32 to index
    %4 = arith.index_cast %arg2 : i32 to index
    %5 = memref.load %arg3[%3, %4] : memref<2x1xi32, #tpu.memory_space<smem>>
    %c0_i32_1 = arith.constant 0 : i32
    %6 = arith.cmpi ne, %5, %c0_i32_1 : i32
    %7 = arith.extui %6 : i1 to i32
    %c0_i32_2 = arith.constant 0 : i32
    %8 = arith.cmpi ne, %7, %c0_i32_2 : i32
    scf.if %8 {
      %c0 = arith.constant 0 : index
      %c0_5 = arith.constant 0 : index
      %c0_6 = arith.constant 0 : index
      %12 = vector.load %arg4[%c0, %c0_5, %c0_6] : memref<1x1x16xf32, #tpu.memory_space<vmem>>, vector<1x1x16xf32>
      %13 = vector.shape_cast %12 : vector<1x1x16xf32> to vector<1x16xf32>
      %cst = arith.constant 1.000000e+00 : f32
      %14 = vector.broadcast %cst : f32 to vector<1x16xf32>
      %15 = arith.subf %13, %14 : vector<1x16xf32>
      %cst_7 = arith.constant 1.000000e+09 : f32
      %16 = vector.broadcast %cst_7 : f32 to vector<1x16xf32>
      %17 = arith.mulf %15, %16 : vector<1x16xf32>
      %c0_8 = arith.constant 0 : index
      %c0_9 = arith.constant 0 : index
      %c0_10 = arith.constant 0 : index
      %18 = vector.load %arg5[%c0_8, %c0_9, %c0_10] : memref<1x16x32xbf16, #tpu.memory_space<vmem>>, vector<1x16x8xbf16>
      %19 = vector.shape_cast %18 : vector<1x16x8xbf16> to vector<16x8xbf16>
      %c0_11 = arith.constant 0 : index
      %c0_12 = arith.constant 0 : index
      %c0_13 = arith.constant 0 : index
      %20 = vector.load %arg6[%c0_11, %c0_12, %c0_13] : memref<1x16x32xbf16, #tpu.memory_space<vmem>>, vector<1x16x8xbf16>
      %21 = vector.shape_cast %20 : vector<1x16x8xbf16> to vector<16x8xbf16>
      %c0_14 = arith.constant 0 : index
      %c0_15 = arith.constant 0 : index
      %c0_16 = arith.constant 0 : index
      %22 = vector.load %arg7[%c0_14, %c0_15, %c0_16] : memref<1x16x32xbf16, #tpu.memory_space<vmem>>, vector<1x16x8xbf16>
      %23 = vector.shape_cast %22 : vector<1x16x8xbf16> to vector<16x8xbf16>
      %cst_17 = arith.constant dense<0.000000e+00> : vector<16x16xf32>
      %24 = tpu.matmul %19, %21, %cst_17 {dimension_numbers = #tpu.dot_dimension_numbers<[1], [1], [0], [0], [0, 0, 1, 0], [], []>} : vector<16x8xbf16>, vector<16x8xbf16>, vector<16x16xf32> -> vector<16x16xf32>
      %cst_18 = arith.constant 0.353553385 : f32
      %25 = vector.broadcast %cst_18 : f32 to vector<16x16xf32>
      %26 = arith.mulf %24, %25 : vector<16x16xf32>
      %27 = vector.broadcast %17 : vector<1x16xf32> to vector<16x16xf32>
      %28 = arith.addf %26, %27 : vector<16x16xf32>
      %c0_19 = arith.constant 0 : index
      %c0_20 = arith.constant 0 : index
      %29 = vector.load %arg9[%c0_19, %c0_20] : memref<16x4xf32, #tpu.memory_space<vmem>>, vector<16x1xf32>
      %c0_21 = arith.constant 0 : index
      %c0_22 = arith.constant 0 : index
      %30 = vector.load %arg10[%c0_21, %c0_22] : memref<16x4xf32, #tpu.memory_space<vmem>>, vector<16x1xf32>
      %c0_23 = arith.constant 0 : index
      %c0_24 = arith.constant 0 : index
      %31 = vector.load %arg11[%c0_23, %c0_24] : memref<16x32xf32, #tpu.memory_space<vmem>>, vector<16x8xf32>
      %cst_25 = arith.constant dense<0xFF800000> : vector<16xf32>
      %32 = vector.multi_reduction <maximumf>, %28, %cst_25 [1] : vector<16x16xf32> to vector<16xf32>
      %33 = vector.shape_cast %32 : vector<16xf32> to vector<16x1xf32>
      %34 = arith.maximumf %29, %33 : vector<16x1xf32>
      %35 = arith.subf %29, %34 : vector<16x1xf32>
      %36 = math.exp %35 : vector<16x1xf32>
      %37 = vector.broadcast %34 : vector<16x1xf32> to vector<16x16xf32>
      %38 = arith.subf %28, %37 : vector<16x16xf32>
      %39 = math.exp %38 : vector<16x16xf32>
      %40 = vector.broadcast %13 : vector<1x16xf32> to vector<16x16xf32>
      %41 = arith.mulf %39, %40 : vector<16x16xf32>
      %42 = arith.mulf %36, %30 : vector<16x1xf32>
      %cst_26 = arith.constant dense<0.000000e+00> : vector<16xf32>
      %43 = vector.multi_reduction <add>, %41, %cst_26 [1] : vector<16x16xf32> to vector<16xf32>
      %44 = vector.shape_cast %43 : vector<16xf32> to vector<16x1xf32>
      %45 = arith.addf %42, %44 : vector<16x1xf32>
      %c0_27 = arith.constant 0 : index
      %c0_28 = arith.constant 0 : index
      %46 = vector.load %arg10[%c0_27, %c0_28] : memref<16x4xf32, #tpu.memory_space<vmem>>, vector<16x1xf32>
      tpu.vector_store %arg10[%c0_27, %c0_28], %45 {strides = array<i32>} : memref<16x4xf32, #tpu.memory_space<vmem>>, vector<16x1xf32>,
      %47 = vector.broadcast %36 : vector<16x1xf32> to vector<16x8xf32>
      %48 = arith.mulf %47, %31 : vector<16x8xf32>
      %49 = arith.truncf %41 : vector<16x16xf32> to vector<16x16xbf16>
      %cst_29 = arith.constant dense<0.000000e+00> : vector<16x8xf32>
      %50 = tpu.matmul %49, %23, %cst_29 {dimension_numbers = #tpu.dot_dimension_numbers<[1], [0], [0], [1], [0, 0, 1, 1], [], []>} : vector<16x16xbf16>, vector<16x8xbf16>, vector<16x8xf32> -> vector<16x8xf32>
      %51 = arith.addf %48, %50 : vector<16x8xf32>
      %c0_30 = arith.constant 0 : index
      %c0_31 = arith.constant 0 : index
      %52 = vector.load %arg11[%c0_30, %c0_31] : memref<16x32xf32, #tpu.memory_space<vmem>>, vector<16x8xf32>
      tpu.vector_store %arg11[%c0_30, %c0_31], %51 {strides = array<i32>} : memref<16x32xf32, #tpu.memory_space<vmem>>, vector<16x8xf32>,
      %c0_32 = arith.constant 0 : index
      %c0_33 = arith.constant 0 : index
      %53 = vector.load %arg9[%c0_32, %c0_33] : memref<16x4xf32, #tpu.memory_space<vmem>>, vector<16x1xf32>
      tpu.vector_store %arg9[%c0_32, %c0_33], %34 {strides = array<i32>} : memref<16x4xf32, #tpu.memory_space<vmem>>, vector<16x1xf32>,
      %c0_34 = arith.constant 0 : index
      %c0_35 = arith.constant 0 : index
      %c8 = arith.constant 8 : index
      %54 = vector.load %arg5[%c0_34, %c0_35, %c8] : memref<1x16x32xbf16, #tpu.memory_space<vmem>>, vector<1x16x8xbf16>
      %55 = vector.shape_cast %54 : vector<1x16x8xbf16> to vector<16x8xbf16>
      %c0_36 = arith.constant 0 : index
      %c0_37 = arith.constant 0 : index
      %c8_38 = arith.constant 8 : index
      %56 = vector.load %arg6[%c0_36, %c0_37, %c8_38] : memref<1x16x32xbf16, #tpu.memory_space<vmem>>, vector<1x16x8xbf16>
      %57 = vector.shape_cast %56 : vector<1x16x8xbf16> to vector<16x8xbf16>
      %c0_39 = arith.constant 0 : index
      %c0_40 = arith.constant 0 : index
      %c8_41 = arith.constant 8 : index
      %58 = vector.load %arg7[%c0_39, %c0_40, %c8_41] : memref<1x16x32xbf16, #tpu.memory_space<vmem>>, vector<1x16x8xbf16>
      %59 = vector.shape_cast %58 : vector<1x16x8xbf16> to vector<16x8xbf16>
      %cst_42 = arith.constant dense<0.000000e+00> : vector<16x16xf32>
      %60 = tpu.matmul %55, %57, %cst_42 {dimension_numbers = #tpu.dot_dimension_numbers<[1], [1], [0], [0], [0, 0, 1, 0], [], []>} : vector<16x8xbf16>, vector<16x8xbf16>, vector<16x16xf32> -> vector<16x16xf32>
      %cst_43 = arith.constant 0.353553385 : f32
      %61 = vector.broadcast %cst_43 : f32 to vector<16x16xf32>
      %62 = arith.mulf %60, %61 : vector<16x16xf32>
      %63 = vector.broadcast %17 : vector<1x16xf32> to vector<16x16xf32>
      %64 = arith.addf %62, %63 : vector<16x16xf32>
      %c0_44 = arith.constant 0 : index
      %c1 = arith.constant 1 : index
      %65 = vector.load %arg9[%c0_44, %c1] : memref<16x4xf32, #tpu.memory_space<vmem>>, vector<16x1xf32>
      %c0_45 = arith.constant 0 : index
      %c1_46 = arith.constant 1 : index
      %66 = vector.load %arg10[%c0_45, %c1_46] : memref<16x4xf32, #tpu.memory_space<vmem>>, vector<16x1xf32>
      %c0_47 = arith.constant 0 : index
      %c8_48 = arith.constant 8 : index
      %67 = vector.load %arg11[%c0_47, %c8_48] : memref<16x32xf32, #tpu.memory_space<vmem>>, vector<16x8xf32>
      %cst_49 = arith.constant dense<0xFF800000> : vector<16xf32>
      %68 = vector.multi_reduction <maximumf>, %64, %cst_49 [1] : vector<16x16xf32> to vector<16xf32>
      %69 = vector.shape_cast %68 : vector<16xf32> to vector<16x1xf32>
      %70 = arith.maximumf %65, %69 : vector<16x1xf32>
      %71 = arith.subf %65, %70 : vector<16x1xf32>
      %72 = math.exp %71 : vector<16x1xf32>
      %73 = vector.broadcast %70 : vector<16x1xf32> to vector<16x16xf32>
      %74 = arith.subf %64, %73 : vector<16x16xf32>
      %75 = math.exp %74 : vector<16x16xf32>
      %76 = vector.broadcast %13 : vector<1x16xf32> to vector<16x16xf32>
      %77 = arith.mulf %75, %76 : vector<16x16xf32>
      %78 = arith.mulf %72, %66 : vector<16x1xf32>
      %cst_50 = arith.constant dense<0.000000e+00> : vector<16xf32>
      %79 = vector.multi_reduction <add>, %77, %cst_50 [1] : vector<16x16xf32> to vector<16xf32>
      %80 = vector.shape_cast %79 : vector<16xf32> to vector<16x1xf32>
      %81 = arith.addf %78, %80 : vector<16x1xf32>
      %c0_51 = arith.constant 0 : index
      %c1_52 = arith.constant 1 : index
      %82 = vector.load %arg10[%c0_51, %c1_52] : memref<16x4xf32, #tpu.memory_space<vmem>>, vector<16x1xf32>
      tpu.vector_store %arg10[%c0_51, %c1_52], %81 {strides = array<i32>} : memref<16x4xf32, #tpu.memory_space<vmem>>, vector<16x1xf32>,
      %83 = vector.broadcast %72 : vector<16x1xf32> to vector<16x8xf32>
      %84 = arith.mulf %83, %67 : vector<16x8xf32>
      %85 = arith.truncf %77 : vector<16x16xf32> to vector<16x16xbf16>
      %cst_53 = arith.constant dense<0.000000e+00> : vector<16x8xf32>
      %86 = tpu.matmul %85, %59, %cst_53 {dimension_numbers = #tpu.dot_dimension_numbers<[1], [0], [0], [1], [0, 0, 1, 1], [], []>} : vector<16x16xbf16>, vector<16x8xbf16>, vector<16x8xf32> -> vector<16x8xf32>
      %87 = arith.addf %84, %86 : vector<16x8xf32>
      %c0_54 = arith.constant 0 : index
      %c8_55 = arith.constant 8 : index
      %88 = vector.load %arg11[%c0_54, %c8_55] : memref<16x32xf32, #tpu.memory_space<vmem>>, vector<16x8xf32>
      tpu.vector_store %arg11[%c0_54, %c8_55], %87 {strides = array<i32>} : memref<16x32xf32, #tpu.memory_space<vmem>>, vector<16x8xf32>,
      %c0_56 = arith.constant 0 : index
      %c1_57 = arith.constant 1 : index
      %89 = vector.load %arg9[%c0_56, %c1_57] : memref<16x4xf32, #tpu.memory_space<vmem>>, vector<16x1xf32>
      tpu.vector_store %arg9[%c0_56, %c1_57], %70 {strides = array<i32>} : memref<16x4xf32, #tpu.memory_space<vmem>>, vector<16x1xf32>,
      %c0_58 = arith.constant 0 : index
      %c0_59 = arith.constant 0 : index
      %c16 = arith.constant 16 : index
      %90 = vector.load %arg5[%c0_58, %c0_59, %c16] : memref<1x16x32xbf16, #tpu.memory_space<vmem>>, vector<1x16x8xbf16>
      %91 = vector.shape_cast %90 : vector<1x16x8xbf16> to vector<16x8xbf16>
      %c0_60 = arith.constant 0 : index
      %c0_61 = arith.constant 0 : index
      %c16_62 = arith.constant 16 : index
      %92 = vector.load %arg6[%c0_60, %c0_61, %c16_62] : memref<1x16x32xbf16, #tpu.memory_space<vmem>>, vector<1x16x8xbf16>
      %93 = vector.shape_cast %92 : vector<1x16x8xbf16> to vector<16x8xbf16>
      %c0_63 = arith.constant 0 : index
      %c0_64 = arith.constant 0 : index
      %c16_65 = arith.constant 16 : index
      %94 = vector.load %arg7[%c0_63, %c0_64, %c16_65] : memref<1x16x32xbf16, #tpu.memory_space<vmem>>, vector<1x16x8xbf16>
      %95 = vector.shape_cast %94 : vector<1x16x8xbf16> to vector<16x8xbf16>
      %cst_66 = arith.constant dense<0.000000e+00> : vector<16x16xf32>
      %96 = tpu.matmul %91, %93, %cst_66 {dimension_numbers = #tpu.dot_dimension_numbers<[1], [1], [0], [0], [0, 0, 1, 0], [], []>} : vector<16x8xbf16>, vector<16x8xbf16>, vector<16x16xf32> -> vector<16x16xf32>
      %cst_67 = arith.constant 0.353553385 : f32
      %97 = vector.broadcast %cst_67 : f32 to vector<16x16xf32>
      %98 = arith.mulf %96, %97 : vector<16x16xf32>
      %99 = vector.broadcast %17 : vector<1x16xf32> to vector<16x16xf32>
      %100 = arith.addf %98, %99 : vector<16x16xf32>
      %c0_68 = arith.constant 0 : index
      %c2 = arith.constant 2 : index
      %101 = vector.load %arg9[%c0_68, %c2] : memref<16x4xf32, #tpu.memory_space<vmem>>, vector<16x1xf32>
      %c0_69 = arith.constant 0 : index
      %c2_70 = arith.constant 2 : index
      %102 = vector.load %arg10[%c0_69, %c2_70] : memref<16x4xf32, #tpu.memory_space<vmem>>, vector<16x1xf32>
      %c0_71 = arith.constant 0 : index
      %c16_72 = arith.constant 16 : index
      %103 = vector.load %arg11[%c0_71, %c16_72] : memref<16x32xf32, #tpu.memory_space<vmem>>, vector<16x8xf32>
      %cst_73 = arith.constant dense<0xFF800000> : vector<16xf32>
      %104 = vector.multi_reduction <maximumf>, %100, %cst_73 [1] : vector<16x16xf32> to vector<16xf32>
      %105 = vector.shape_cast %104 : vector<16xf32> to vector<16x1xf32>
      %106 = arith.maximumf %101, %105 : vector<16x1xf32>
      %107 = arith.subf %101, %106 : vector<16x1xf32>
      %108 = math.exp %107 : vector<16x1xf32>
      %109 = vector.broadcast %106 : vector<16x1xf32> to vector<16x16xf32>
      %110 = arith.subf %100, %109 : vector<16x16xf32>
      %111 = math.exp %110 : vector<16x16xf32>
      %112 = vector.broadcast %13 : vector<1x16xf32> to vector<16x16xf32>
      %113 = arith.mulf %111, %112 : vector<16x16xf32>
      %114 = arith.mulf %108, %102 : vector<16x1xf32>
      %cst_74 = arith.constant dense<0.000000e+00> : vector<16xf32>
      %115 = vector.multi_reduction <add>, %113, %cst_74 [1] : vector<16x16xf32> to vector<16xf32>
      %116 = vector.shape_cast %115 : vector<16xf32> to vector<16x1xf32>
      %117 = arith.addf %114, %116 : vector<16x1xf32>
      %c0_75 = arith.constant 0 : index
      %c2_76 = arith.constant 2 : index
      %118 = vector.load %arg10[%c0_75, %c2_76] : memref<16x4xf32, #tpu.memory_space<vmem>>, vector<16x1xf32>
      tpu.vector_store %arg10[%c0_75, %c2_76], %117 {strides = array<i32>} : memref<16x4xf32, #tpu.memory_space<vmem>>, vector<16x1xf32>,
      %119 = vector.broadcast %108 : vector<16x1xf32> to vector<16x8xf32>
      %120 = arith.mulf %119, %103 : vector<16x8xf32>
      %121 = arith.truncf %113 : vector<16x16xf32> to vector<16x16xbf16>
      %cst_77 = arith.constant dense<0.000000e+00> : vector<16x8xf32>
      %122 = tpu.matmul %121, %95, %cst_77 {dimension_numbers = #tpu.dot_dimension_numbers<[1], [0], [0], [1], [0, 0, 1, 1], [], []>} : vector<16x16xbf16>, vector<16x8xbf16>, vector<16x8xf32> -> vector<16x8xf32>
      %123 = arith.addf %120, %122 : vector<16x8xf32>
      %c0_78 = arith.constant 0 : index
      %c16_79 = arith.constant 16 : index
      %124 = vector.load %arg11[%c0_78, %c16_79] : memref<16x32xf32, #tpu.memory_space<vmem>>, vector<16x8xf32>
      tpu.vector_store %arg11[%c0_78, %c16_79], %123 {strides = array<i32>} : memref<16x32xf32, #tpu.memory_space<vmem>>, vector<16x8xf32>,
      %c0_80 = arith.constant 0 : index
      %c2_81 = arith.constant 2 : index
      %125 = vector.load %arg9[%c0_80, %c2_81] : memref<16x4xf32, #tpu.memory_space<vmem>>, vector<16x1xf32>
      tpu.vector_store %arg9[%c0_80, %c2_81], %106 {strides = array<i32>} : memref<16x4xf32, #tpu.memory_space<vmem>>, vector<16x1xf32>,
      %c0_82 = arith.constant 0 : index
      %c0_83 = arith.constant 0 : index
      %c24 = arith.constant 24 : index
      %126 = vector.load %arg5[%c0_82, %c0_83, %c24] : memref<1x16x32xbf16, #tpu.memory_space<vmem>>, vector<1x16x8xbf16>
      %127 = vector.shape_cast %126 : vector<1x16x8xbf16> to vector<16x8xbf16>
      %c0_84 = arith.constant 0 : index
      %c0_85 = arith.constant 0 : index
      %c24_86 = arith.constant 24 : index
      %128 = vector.load %arg6[%c0_84, %c0_85, %c24_86] : memref<1x16x32xbf16, #tpu.memory_space<vmem>>, vector<1x16x8xbf16>
      %129 = vector.shape_cast %128 : vector<1x16x8xbf16> to vector<16x8xbf16>
      %c0_87 = arith.constant 0 : index
      %c0_88 = arith.constant 0 : index
      %c24_89 = arith.constant 24 : index
      %130 = vector.load %arg7[%c0_87, %c0_88, %c24_89] : memref<1x16x32xbf16, #tpu.memory_space<vmem>>, vector<1x16x8xbf16>
      %131 = vector.shape_cast %130 : vector<1x16x8xbf16> to vector<16x8xbf16>
      %cst_90 = arith.constant dense<0.000000e+00> : vector<16x16xf32>
      %132 = tpu.matmul %127, %129, %cst_90 {dimension_numbers = #tpu.dot_dimension_numbers<[1], [1], [0], [0], [0, 0, 1, 0], [], []>} : vector<16x8xbf16>, vector<16x8xbf16>, vector<16x16xf32> -> vector<16x16xf32>
      %cst_91 = arith.constant 0.353553385 : f32
      %133 = vector.broadcast %cst_91 : f32 to vector<16x16xf32>
      %134 = arith.mulf %132, %133 : vector<16x16xf32>
      %135 = vector.broadcast %17 : vector<1x16xf32> to vector<16x16xf32>
      %136 = arith.addf %134, %135 : vector<16x16xf32>
      %c0_92 = arith.constant 0 : index
      %c3 = arith.constant 3 : index
      %137 = vector.load %arg9[%c0_92, %c3] : memref<16x4xf32, #tpu.memory_space<vmem>>, vector<16x1xf32>
      %c0_93 = arith.constant 0 : index
      %c3_94 = arith.constant 3 : index
      %138 = vector.load %arg10[%c0_93, %c3_94] : memref<16x4xf32, #tpu.memory_space<vmem>>, vector<16x1xf32>
      %c0_95 = arith.constant 0 : index
      %c24_96 = arith.constant 24 : index
      %139 = vector.load %arg11[%c0_95, %c24_96] : memref<16x32xf32, #tpu.memory_space<vmem>>, vector<16x8xf32>
      %cst_97 = arith.constant dense<0xFF800000> : vector<16xf32>
      %140 = vector.multi_reduction <maximumf>, %136, %cst_97 [1] : vector<16x16xf32> to vector<16xf32>
      %141 = vector.shape_cast %140 : vector<16xf32> to vector<16x1xf32>
      %142 = arith.maximumf %137, %141 : vector<16x1xf32>
      %143 = arith.subf %137, %142 : vector<16x1xf32>
      %144 = math.exp %143 : vector<16x1xf32>
      %145 = vector.broadcast %142 : vector<16x1xf32> to vector<16x16xf32>
      %146 = arith.subf %136, %145 : vector<16x16xf32>
      %147 = math.exp %146 : vector<16x16xf32>
      %148 = vector.broadcast %13 : vector<1x16xf32> to vector<16x16xf32>
      %149 = arith.mulf %147, %148 : vector<16x16xf32>
      %150 = arith.mulf %144, %138 : vector<16x1xf32>
      %cst_98 = arith.constant dense<0.000000e+00> : vector<16xf32>
      %151 = vector.multi_reduction <add>, %149, %cst_98 [1] : vector<16x16xf32> to vector<16xf32>
      %152 = vector.shape_cast %151 : vector<16xf32> to vector<16x1xf32>
      %153 = arith.addf %150, %152 : vector<16x1xf32>
      %c0_99 = arith.constant 0 : index
      %c3_100 = arith.constant 3 : index
      %154 = vector.load %arg10[%c0_99, %c3_100] : memref<16x4xf32, #tpu.memory_space<vmem>>, vector<16x1xf32>
      tpu.vector_store %arg10[%c0_99, %c3_100], %153 {strides = array<i32>} : memref<16x4xf32, #tpu.memory_space<vmem>>, vector<16x1xf32>,
      %155 = vector.broadcast %144 : vector<16x1xf32> to vector<16x8xf32>
      %156 = arith.mulf %155, %139 : vector<16x8xf32>
      %157 = arith.truncf %149 : vector<16x16xf32> to vector<16x16xbf16>
      %cst_101 = arith.constant dense<0.000000e+00> : vector<16x8xf32>
      %158 = tpu.matmul %157, %131, %cst_101 {dimension_numbers = #tpu.dot_dimension_numbers<[1], [0], [0], [1], [0, 0, 1, 1], [], []>} : vector<16x16xbf16>, vector<16x8xbf16>, vector<16x8xf32> -> vector<16x8xf32>
      %159 = arith.addf %156, %158 : vector<16x8xf32>
      %c0_102 = arith.constant 0 : index
      %c24_103 = arith.constant 24 : index
      %160 = vector.load %arg11[%c0_102, %c24_103] : memref<16x32xf32, #tpu.memory_space<vmem>>, vector<16x8xf32>
      tpu.vector_store %arg11[%c0_102, %c24_103], %159 {strides = array<i32>} : memref<16x32xf32, #tpu.memory_space<vmem>>, vector<16x8xf32>,
      %c0_104 = arith.constant 0 : index
      %c3_105 = arith.constant 3 : index
      %161 = vector.load %arg9[%c0_104, %c3_105] : memref<16x4xf32, #tpu.memory_space<vmem>>, vector<16x1xf32>
      tpu.vector_store %arg9[%c0_104, %c3_105], %142 {strides = array<i32>} : memref<16x4xf32, #tpu.memory_space<vmem>>, vector<16x1xf32>,
    } else {
    }
    %c0_i32_3 = arith.constant 0 : i32
    %9 = arith.cmpi eq, %arg2, %c0_i32_3 : i32
    %10 = arith.extui %9 : i1 to i32
    %c0_i32_4 = arith.constant 0 : i32
    %11 = arith.cmpi ne, %10, %c0_i32_4 : i32
    scf.if %11 {
      %c0 = arith.constant 0 : index
      %c0_5 = arith.constant 0 : index
      %12 = vector.load %arg10[%c0, %c0_5] : memref<16x4xf32, #tpu.memory_space<vmem>>, vector<16x4xf32>
      %cst = arith.constant 0.000000e+00 : f32
      %13 = vector.broadcast %cst : f32 to vector<16x4xf32>
      %14 = arith.cmpf oeq, %12, %13 : vector<16x4xf32>
      %cst_6 = arith.constant 1.000000e+00 : f32
      %15 = vector.broadcast %cst_6 : f32 to vector<16x4xf32>
      %16 = arith.select %14, %15, %12 : vector<16x4xi1>, vector<16x4xf32>
      %17 = tpu.reciprocal %16 {approx = true} : vector<16x4xf32> -> vector<16x4xf32>
      %c0_7 = arith.constant 0 : index
      %c0_8 = arith.constant 0 : index
      %18 = vector.load %arg11[%c0_7, %c0_8] : memref<16x32xf32, #tpu.memory_space<vmem>>, vector<16x8xf32>
      %19 = vector.extract_strided_slice %17 {offsets = [0, 0], sizes = [16, 1], strides = [1, 1]} : vector<16x4xf32> to vector<16x1xf32>
      %20 = vector.broadcast %19 : vector<16x1xf32> to vector<16x8xf32>
      %21 = arith.mulf %18, %20 : vector<16x8xf32>
      %c0_9 = arith.constant 0 : index
      %c0_10 = arith.constant 0 : index
      %22 = vector.load %arg11[%c0_9, %c0_10] : memref<16x32xf32, #tpu.memory_space<vmem>>, vector<16x8xf32>
      tpu.vector_store %arg11[%c0_9, %c0_10], %21 {strides = array<i32>} : memref<16x32xf32, #tpu.memory_space<vmem>>, vector<16x8xf32>,
      %c0_11 = arith.constant 0 : index
      %c8 = arith.constant 8 : index
      %23 = vector.load %arg11[%c0_11, %c8] : memref<16x32xf32, #tpu.memory_space<vmem>>, vector<16x8xf32>
      %24 = vector.extract_strided_slice %17 {offsets = [0, 1], sizes = [16, 1], strides = [1, 1]} : vector<16x4xf32> to vector<16x1xf32>
      %25 = vector.broadcast %24 : vector<16x1xf32> to vector<16x8xf32>
      %26 = arith.mulf %23, %25 : vector<16x8xf32>
      %c0_12 = arith.constant 0 : index
      %c8_13 = arith.constant 8 : index
      %27 = vector.load %arg11[%c0_12, %c8_13] : memref<16x32xf32, #tpu.memory_space<vmem>>, vector<16x8xf32>
      tpu.vector_store %arg11[%c0_12, %c8_13], %26 {strides = array<i32>} : memref<16x32xf32, #tpu.memory_space<vmem>>, vector<16x8xf32>,
      %c0_14 = arith.constant 0 : index
      %c16 = arith.constant 16 : index
      %28 = vector.load %arg11[%c0_14, %c16] : memref<16x32xf32, #tpu.memory_space<vmem>>, vector<16x8xf32>
      %29 = vector.extract_strided_slice %17 {offsets = [0, 2], sizes = [16, 1], strides = [1, 1]} : vector<16x4xf32> to vector<16x1xf32>
      %30 = vector.broadcast %29 : vector<16x1xf32> to vector<16x8xf32>
      %31 = arith.mulf %28, %30 : vector<16x8xf32>
      %c0_15 = arith.constant 0 : index
      %c16_16 = arith.constant 16 : index
      %32 = vector.load %arg11[%c0_15, %c16_16] : memref<16x32xf32, #tpu.memory_space<vmem>>, vector<16x8xf32>
      tpu.vector_store %arg11[%c0_15, %c16_16], %31 {strides = array<i32>} : memref<16x32xf32, #tpu.memory_space<vmem>>, vector<16x8xf32>,
      %c0_17 = arith.constant 0 : index
      %c24 = arith.constant 24 : index
      %33 = vector.load %arg11[%c0_17, %c24] : memref<16x32xf32, #tpu.memory_space<vmem>>, vector<16x8xf32>
      %34 = vector.extract_strided_slice %17 {offsets = [0, 3], sizes = [16, 1], strides = [1, 1]} : vector<16x4xf32> to vector<16x1xf32>
      %35 = vector.broadcast %34 : vector<16x1xf32> to vector<16x8xf32>
      %36 = arith.mulf %33, %35 : vector<16x8xf32>
      %c0_18 = arith.constant 0 : index
      %c24_19 = arith.constant 24 : index
      %37 = vector.load %arg11[%c0_18, %c24_19] : memref<16x32xf32, #tpu.memory_space<vmem>>, vector<16x8xf32>
      tpu.vector_store %arg11[%c0_18, %c24_19], %36 {strides = array<i32>} : memref<16x32xf32, #tpu.memory_space<vmem>>, vector<16x8xf32>,
      %c0_20 = arith.constant 0 : index
      %c0_21 = arith.constant 0 : index
      %38 = vector.load %arg11[%c0_20, %c0_21] : memref<16x32xf32, #tpu.memory_space<vmem>>, vector<16x32xf32>
      %39 = arith.truncf %38 : vector<16x32xf32> to vector<16x32xbf16>
      %c0_22 = arith.constant 0 : index
      %c0_23 = arith.constant 0 : index
      %c0_24 = arith.constant 0 : index
      %40 = vector.load %arg8[%c0_22, %c0_23, %c0_24] : memref<1x16x32xbf16, #tpu.memory_space<vmem>>, vector<1x16x32xbf16>
      %41 = vector.shape_cast %40 : vector<1x16x32xbf16> to vector<16x32xbf16>
      %42 = vector.shape_cast %39 : vector<16x32xbf16> to vector<1x16x32xbf16>
      tpu.vector_store %arg8[%c0_22, %c0_23, %c0_24], %42 {strides = array<i32>} : memref<1x16x32xbf16, #tpu.memory_space<vmem>>, vector<1x16x32xbf16>,
    } else {
    }
    return
  }
  func.func @transform_0(%arg0: i32, %arg1: i32, %arg2: i32, %arg3: memref<2x1xi32, #tpu.memory_space<smem>>) -> (i32, i32, i32) {
    %c0_i32 = arith.constant 0 : i32
    %c0_i32_0 = arith.constant 0 : i32
    return %arg0, %c0_i32, %arg2 : i32, i32, i32
  }
  func.func @transform_1(%arg0: i32, %arg1: i32, %arg2: i32, %arg3: memref<2x1xi32, #tpu.memory_space<smem>>) -> (i32, i32, i32) {
    %c0_i32 = arith.constant 0 : i32
    %c0_i32_0 = arith.constant 0 : i32
    return %arg0, %arg1, %c0_i32 : i32, i32, i32
  }
  func.func @transform_2(%arg0: i32, %arg1: i32, %arg2: i32, %arg3: memref<2x1xi32, #tpu.memory_space<smem>>) -> (i32, i32, i32) {
    %c0_i32 = arith.constant 0 : i32
    %c0_i32_0 = arith.constant 0 : i32
    return %arg0, %arg2, %c0_i32 : i32, i32, i32
  }
  func.func @transform_3(%arg0: i32, %arg1: i32, %arg2: i32, %arg3: memref<2x1xi32, #tpu.memory_space<smem>>) -> (i32, i32, i32) {
    %c0_i32 = arith.constant 0 : i32
    %c0_i32_0 = arith.constant 0 : i32
    return %arg0, %arg2, %c0_i32 : i32, i32, i32
  }
  func.func @transform_4(%arg0: i32, %arg1: i32, %arg2: i32, %arg3: memref<2x1xi32, #tpu.memory_space<smem>>) -> (i32, i32, i32) {
    %c0_i32 = arith.constant 0 : i32
    %c0_i32_0 = arith.constant 0 : i32
    return %arg0, %arg1, %c0_i32 : i32, i32, i32
  }
}

</mosaic_0001>

<bundles_post_ra>
// kernel: multi_headed_self_attention.3
= control target key start
LH: loop header
LB: loop body
LE: loop exit
PB: predicated region body
PF: predicated region fallthrough
CT: control target
= control target key end

     0   :  { %s568_s18 = smov 0   ;;  %s606_s0 = inlined_call_operand.vmem [shape: f32[32,32], index: 0, kind: input, shape index: {}]   ;;  %s607_s1 = inlined_call_operand.vmem [shape: bf16[32,96], index: 1, kind: input, shape index: {}]   ;;  %s608_s2 = inlined_call_operand.vmem [shape: f32[1,96], index: 2, kind: input, shape index: {}]   ;;  %s609_s3 = inlined_call_operand.vmem [shape: bf16[32,32], index: 3, kind: output, shape index: {0}]   ;;  %s610_s4 = inlined_call_operand.vmem [shape: bf16[32,32], index: 4, kind: output, shape index: {1}]   ;;  %s611_s5 = inlined_call_operand.vmem [shape: bf16[32,32], index: 5, kind: output, shape index: {2}]  }
   0x1 LB: > { %s478_s19 = sadd.s32 4294967295, %s532_s18   ;;  %p482_p0 = scmp.ge.s32.totalorder %s532_s18, 1  ;;  %s532_s18 = sphi %s568_s18, %s16_s18  }
   0x2   : > { %p193_p1 = scmp.lt.s32.totalorder %s532_s18, 3 }
   0x4   : > { %p194_p2 = pnand %p482_p0, %p193_p1 }
   0x5   : > { %v524_v0 = vld [vmem:[%s607_s1] sm:$0xff] (!%p194_p2)   ;;  %v534_v1 = vmov (!%p194_p2), 0.0   ;;  %v525_v2 = vld [vmem:[%s607_s1 + $0x8] sm:$0xff] (!%p194_p2)   ;;  %vm535_vm0 = vmmov (!%p194_p2), 0   ;;  %s483_s24 = sshll.u32 (!%p194_p2), %s478_s19, 1  ;;  %vm282_vm1 = vcmask (!%p194_p2), 261120  }
   0x6   : > { %197 = sbr.rel (%p194_p2) target bundleno = 357 (0x165), region = 32  ;;  %504 = vmatprep.subr.bf16.mxu0 (!%p194_p2), %v534_v1  ;;  %508 = vmatprep.mubr.msk.bf16.mxu0 (!%p194_p2), %vm535_vm0, %v534_v1  ;;  %p232_p3 = scmp.lt.s32.totalorder (!%p194_p2), %s483_s24, 3  ;;  %v491_v6 = vld [vmem:[%s608_s2] ss:$0 sm:$0xff] (!%p194_p2)  ;;  %vm335_vm2 = vcmask (!%p194_p2), 257024  }
   0x7   : > { %505 = vmatpush3.bf16.msra.mxu0 (!%p194_p2), %v524_v0  ;;  %s536_s10 = smov (!%p194_p2), 96   ;;  %s537_s11 = smov (!%p194_p2), 64  }
   0x8   : > { %506 = vmatprep.subr.bf16.mxu0 (!%p194_p2), %v534_v1 }
   0xb   : > { %507 = vmatpush3.bf16.msra.mxu0 (!%p194_p2), %v525_v2 }
   0xd   : > { %s613_s24 = smov (!%p232_p3, %s483_s24), 3 }
   0xe   : > { %s484_s25 = sshll.u32 %s613_s24, 3  ;;  %s486_s6 = sshll.u32 %s613_s24, 2 }
   0xf   : > { %s235_s28 = scalar_lea.vmem %s606_s0, %s484_s25  ;;  %s241_s9 = scalar_lea.vmem %s609_s3, %s486_s6 }
  0x10   : > { %v256_v3 = vld [vmem:[%s235_s28] sm:$0xff]  ;;  %v257_v4 = vld [vmem:[%s235_s28 + $0x8] sm:$0xff]  ;;  %s247_s14 = scalar_lea.vmem %s610_s4, %s486_s6  ;;  %s253_s17 = scalar_lea.vmem %s611_s5, %s486_s6 }
  0x11   : > { %v258_v5 = vpack.c.bf16 %v257_v4, %v256_v3 }
  0x13   : > { %509 = vmatmul.mubr.msk.bf16.vlgmr.msra.gmra.mrb[0].mxu0 %vm282_vm1, %v258_v5 }
  0xe6   : > { %v320_v7 = vpop.f32.mrb[0].mxu0 }
  0xe7   : > { %v321_v8 = vadd.f32 %v491_v6, %v320_v7  ;;  %v510_v9 = vpop.f32.mrb[1].mxu0 }
  0xe8   : > { %v323_v10 = vpop.f32.mrb[2].mxu0 }
  0xe9   : > { %v499_v11 = vpack.c.bf16 %v321_v8, %v321_v8  ;;  %v324_v12 = vadd.f32 %v491_v6, %v323_v10  ;;  %v511_v13 = vpop.f32.mrb[3].mxu0 }
  0xeb   : > { %336 = vst.msk [vmem:[%s241_s9] sm:$0xf] %vm335_vm2, %v499_v11  ;;  %v500_v14 = vpack.c.bf16 %v324_v12, %v324_v12  ;;  %338 = vrot.lane.b32.xlu0 %v499_v11, %s536_s10 }
  0xed   : > { %337 = vst.msk [vmem:[%s241_s9 + $0x4] sm:$0xf] %vm335_vm2, %v500_v14  ;;  %340 = vrot.lane.b32.xlu1 %v500_v14, %s536_s10 }
  0xef   : > { %346 = vrot.lane.b32.xlu0 %v499_v11, %s537_s11 }
  0xf1   : > { %348 = vrot.lane.b32.xlu1 %v500_v14, %s537_s11 }
 0x15d   : > { %v339_v15 = vpop.permute.xlu0 %338 }
 0x15e   : > { %344 = vst.msk [vmem:[%s247_s14] sm:$0xf] %vm335_vm2, %v339_v15 }
 0x15f   : > { %v341_v16 = vpop.permute.xlu1 %340 }
 0x160   : > { %345 = vst.msk [vmem:[%s247_s14 + $0x4] sm:$0xf] %vm335_vm2, %v341_v16 }
 0x161   : > { %v347_v17 = vpop.permute.xlu0 %346 }
 0x162   : > { %352 = vst.msk [vmem:[%s253_s17] sm:$0xf] %vm335_vm2, %v347_v17 }
 0x163   : > { %v349_v18 = vpop.permute.xlu1 %348 }
 0x164   : > { %353 = vst.msk [vmem:[%s253_s17 + $0x4] sm:$0xf] %vm335_vm2, %v349_v18 }
 0x165 PF: > { %s16_s18 = sadd.s32 1, %s532_s18  }
 0x166   : > { %p13_p4 = scmp.ge.s32.totalorder %s16_s18, 4  }
 0x168   :  { %15 = sbr.rel (!%p13_p4) target bundleno = 1 (0x1), region = 86 }

// kernel: multi_headed_self_attention.5
= control target key start
LH: loop header
LB: loop body
LE: loop exit
PB: predicated region body
PF: predicated region fallthrough
CT: control target
= control target key end

     0   :  { %s378_s12 = smov 0   ;;  %s404_s0 = inlined_call_operand.vmem [shape: bf16[32,32], index: 0, kind: input, shape index: {}]   ;;  %s405_s1 = inlined_call_operand.vmem [shape: bf16[32,32], index: 1, kind: input, shape index: {}]   ;;  %s406_s2 = inlined_call_operand.vmem [shape: f32[1,32], index: 2, kind: input, shape index: {}]   ;;  %s407_s3 = inlined_call_operand.vmem [shape: f32[32,32], index: 3, kind: output, shape index: {}]  }
   0x1 LB: > { %s308_s13 = sadd.s32 4294967295, %s354_s12   ;;  %p312_p0 = scmp.ge.s32.totalorder %s354_s12, 1  ;;  %s354_s12 = sphi %s378_s12, %s13_s12  }
   0x2   : > { %p138_p1 = scmp.lt.s32.totalorder %s354_s12, 3 }
   0x4   : > { %p139_p2 = pnand %p312_p0, %p138_p1 }
   0x5   : > { %v345_v0 = vld [vmem:[%s405_s1] sm:$0xff] (!%p139_p2)   ;;  %v356_v1 = vmov (!%p139_p2), 0.0   ;;  %v346_v2 = vld [vmem:[%s405_s1 + $0x8] sm:$0xff] (!%p139_p2)   ;;  %vm357_vm0 = vmmov (!%p139_p2), 0   ;;  %s313_s18 = sshll.u32 (!%p139_p2), %s308_s13, 1  ;;  %vm205_vm1 = vcmask (!%p139_p2), 261120  }
   0x6   : > { %142 = sbr.rel (%p139_p2) target bundleno = 234 (0xea), region = 32  ;;  %327 = vmatprep.subr.bf16.mxu0 (!%p139_p2), %v356_v1  ;;  %331 = vmatprep.mubr.msk.bf16.mxu0 (!%p139_p2), %vm357_vm0, %v356_v1  ;;  %p163_p3 = scmp.lt.s32.totalorder (!%p139_p2), %s313_s18, 3  ;;  %v317_v4 = vld [vmem:[%s406_s2] ss:$0 sm:$0xff] (!%p139_p2) }
   0x7   : > { %328 = vmatpush3.bf16.msra.mxu0 (!%p139_p2), %v345_v0 }
   0x8   : > { %329 = vmatprep.subr.bf16.mxu0 (!%p139_p2), %v356_v1 }
   0xb   : > { %330 = vmatpush3.bf16.msra.mxu0 (!%p139_p2), %v346_v2 }
   0xd   : > { %s409_s18 = smov (!%p163_p3, %s313_s18), 3 }
   0xe   : > { %s314_s19 = sshll.u32 %s409_s18, 2  ;;  %s316_s23 = sshll.u32 %s409_s18, 3 }
   0xf   : > { %s166_s22 = scalar_lea.vmem %s404_s0, %s314_s19  ;;  %s172_s28 = scalar_lea.vmem %s407_s3, %s316_s23 }
  0x10   : > { %v347_v3 = vld [vmem:[%s166_s22] sm:$0xff]  }
  0x11   : > { %332 = vmatmul.mubr.msk.bf16.vlgmr.msra.gmra.mrb[0].mxu0 %vm205_vm1, %v347_v3 }
  0xe4   : > { %v243_v5 = vpop.f32.mrb[0].mxu0 }
  0xe5   : > { %v244_v6 = vadd.f32 %v317_v4, %v243_v5  ;;  %v333_v7 = vpop.f32.mrb[1].mxu0 }
  0xe6   : > { %v246_v8 = vpop.f32.mrb[2].mxu0 }
  0xe7   : > { %250 = vst.msk [vmem:[%s172_s28] sm:$0xff] %vm205_vm1, %v244_v6  ;;  %v247_v9 = vadd.f32 %v317_v4, %v246_v8  ;;  %v334_v10 = vpop.f32.mrb[3].mxu0 }
  0xe9   : > { %251 = vst.msk [vmem:[%s172_s28 + $0x8] sm:$0xff] %vm205_vm1, %v247_v9 }
  0xea PF: > { %s13_s12 = sadd.s32 1, %s354_s12  }
  0xeb   : > { %p10_p4 = scmp.ge.s32.totalorder %s13_s12, 4  }
  0xed   :  { %12 = sbr.rel (!%p10_p4) target bundleno = 1 (0x1), region = 62 }

// kernel: multi_headed_self_attention.4
= control target key start
LH: loop header
LB: loop body
LE: loop exit
PB: predicated region body
PF: predicated region fallthrough
CT: control target
= control target key end

     0   :  { %s2024_s0 = inlined_call_operand.vmem [shape: s32[2,1], index: 0, kind: input, shape index: {}]   ;;  %s2025_s1 = inlined_call_operand.vmem [shape: f32[2,1,16], index: 1, kind: input, shape index: {}]   ;;  %s2026_s2 = inlined_call_operand.vmem [shape: bf16[2,16,32], index: 2, kind: input, shape index: {}]   ;;  %s2027_s3 = inlined_call_operand.vmem [shape: bf16[2,16,32], index: 3, kind: input, shape index: {}]   ;;  %s2028_s4 = inlined_call_operand.vmem [shape: bf16[2,16,32], index: 4, kind: input, shape index: {}]   ;;  %s2029_s5 = inlined_call_operand.vmem [shape: bf16[2,16,32], index: 5, kind: output, shape index: {}]  }
   0x1   :  { %s10_s20 = sshll.u32 %s2024_s0, 4  ;;  %s11_s20 = int_to_ptr.vmem [resolvable:$true] %s10_s20 }
   0x2   :  { %s1626_s21 = scalar_lea.vmem %s11_s20, 32  ;;  %p1631_p1 = scmp.lt.s32.totalorder %s11_s20, %s11_s20 }
   0x3   :  { %p1627_p0 = scmp.ne.s32.totalorder %s11_s20, %s1626_s21  ;;  %p1632_p2 = scmp.lt.s32.totalorder %s1626_s21, %s1626_s21 }
   0x5   :  { %p1633_p3 = por %p1632_p2, %p1631_p1 }
   0x7   :  { %p1634_p4 = pnand %p1633_p3, %p1627_p0 }
   0x9   :  { %1637 = shalt.err (!%p1634_p4)  }
   0xa   :  { %s1664_s22 = smov [#allocation6]  }
   0xb   :  { %13 = dma.vmem_to_smem %s11_s20, 32, %s1664_s22, [#allocation5] }
   0xc   :  { %1650 = dma.done.wait [#allocation5], 32 }
   0xd   :  { %1651 = vsyncadd [#allocation5], 4294967264 }
   0xe   :  { %15 = sfence }
   0xf   :  { %s1716_s23 = smov 0   ;;  %s1718_s24 = smov 0  }
  0x10   :  { %s1720_s25 = smov 0  }
  0x11 LB: > { %s40_s0 = sadd.s32 1, %s1658_s24  ;;  %p1411_p5 = scmp.ge.s32.totalorder %s1662_s25, 1  ;;  %s1662_s25 = sphi %s1720_s25, %s21_s25   ;;  %s1658_s24 = sphi %s1718_s24, %s2031_s24   ;;  %s1654_s23 = sphi %s1716_s23, %s2030_s23  }
  0x12   : > { %p42_p6 = scmp.ge.s32.totalorder %s40_s0, 2  ;;  %p244_p7 = scmp.lt.s32.totalorder %s1662_s25, 3 }
  0x14   : > { %s2033_s0 = smov (%p42_p6, %s40_s0), 0  ;;  %p245_p8 = pnand %p1411_p5, %p244_p7 }
  0x15   : > { %p302_p9 = scmp.lt.s32.totalorder (!%p245_p8), %s1654_s23, 1  ;;  %vm353_vm0 = vcmask (!%p245_p8), 31744   ;;  %s1420_s26 = sshll.u32 (!%p245_p8), %s1654_s23, 7  ;;  %vm358_vm1 = vcmask (!%p245_p8), 261120   ;;  %v1665_v0 = vmov (!%p245_p8), -inf   ;;  %v1666_v1 = vmov (!%p245_p8), 0.0  }
  0x16   : > { %248 = sbr.rel (%p245_p8) target bundleno = 1650 (0x672), region = 36  ;;  %354 = vst.msk [vmem:[#allocation2] sm:$0xff] (!%p245_p8), %vm353_vm0, %v1665_v0  ;;  %355 = vst.msk [vmem:[#allocation2 + $0x8] sm:$0xff] (!%p245_p8), %vm353_vm0, %v1665_v0  ;;  %s368_s27 = sld [smem:[#allocation6 + %s1420_s26]] (!%p245_p8) }
  0x17   : > { %356 = vst.msk [vmem:[#allocation3] sm:$0xff] (!%p245_p8), %vm353_vm0, %v1666_v1  ;;  %357 = vst.msk [vmem:[#allocation3 + $0x8] sm:$0xff] (!%p245_p8), %vm353_vm0, %v1666_v1 }
  0x18   : > { %359 = vst.msk [vmem:[#allocation4] sm:$0xff] (!%p245_p8), %vm358_vm1, %v1666_v1  ;;  %360 = vst.msk [vmem:[#allocation4 + $0x8] sm:$0xff] (!%p245_p8), %vm358_vm1, %v1666_v1 }
  0x1c   : > { %p1421_p10 = scmp.eq.s32.totalorder (!%p245_p8), %s368_s27, 0 }
  0x1d   : > { %s2035_s23 = smov (!%p302_p9, %s1654_s23), 1  ;;  %v1667_v3 = vmov (!%p1421_p10), 0.0   ;;  %vm392_vm2 = vcmask (!%p1421_p10), 64512   ;;  %vm1668_vm3 = vmmov (!%p1421_p10), 0   ;;  %v443_v6 = vlaneseq (!%p1421_p10)  ;;  %s1670_s19 = smov (!%p1421_p10), 120   ;;  %v1781_v26 = vld [vmem:[#allocation2] sm:$0xff] (!%p1421_p10) }
  0x1e   : > { %s307_s30 = scalar_lea.vmem %s2025_s1, %s2035_s23  ;;  %s1447_s6 = sshll.u32 %s2035_s23, 3  ;;  %1469 = vmatprep.subr.bf16.mxu0 (!%p1421_p10), %v1667_v3  ;;  %1475 = vmatprep.subr.bf16.mxu1 (!%p1421_p10), %v1667_v3  ;;  %vm456_vm4 = vcmask (!%p1421_p10), 130048   ;;  %v1669_v24 = vmov (!%p1421_p10), 0   ;;  %vm505_vm5 = vcmask (!%p1421_p10), 7168   ;;  %v1786_v29 = vld [vmem:[#allocation2 + $0x8] sm:$0xff] (!%p1421_p10)  ;;  %vm696_vm6 = vcmask (!%p1421_p10), 15368  }
  0x1f   : > { %s1740_s9 = scalar_lea.vmem %s2026_s2, %s1447_s6  ;;  %s1745_s12 = scalar_lea.vmem %s2027_s3, %s1447_s6  ;;  %1471 = vmatprep.mubr.msk.bf16.mxu0 (!%p1421_p10), %vm1668_vm3, %v1667_v3  ;;  %1477 = vmatprep.mubr.msk.bf16.mxu1 (!%p1421_p10), %vm1668_vm3, %v1667_v3  ;;  %v444_v7 = vshrl.u32 (!%p1421_p10), %v443_v6, 7  ;;  %v373_v9 = vld [vmem:[%s307_s30] sm:$0x1] (!%p1421_p10)  ;;  %vm898_vm7 = vcmask (!%p1421_p10), 23568   ;;  %vm1100_vm8 = vcmask (!%p1421_p10), 31768   ;;  %vm774_vm9 = vcmask (!%p1421_p10), 130112  }
  0x20   : > { %s1750_s15 = scalar_lea.vmem %s2028_s4, %s1447_s6  ;;  %s1755_s18 = scalar_lea.vmem %s2029_s5, %s1447_s6  ;;  %v1572_v2 = vld [vmem:[%s1745_s12] sm:$0xff] (!%p1421_p10)   ;;  %v1422_v11 = vadd.f32 (!%p1421_p10), -1.0, %v373_v9  ;;  %1560 = vset.pattern.permute.xlu1 (!%p1421_p10), %v1669_v24  ;;  %vm976_vm10 = vcmask (!%p1421_p10), 195712   ;;  %vm1178_vm11 = vcmask (!%p1421_p10), 261312  }
  0x21   : > { %372 = sbr.rel (%p1421_p10) target bundleno = 1459 (0x5b3), region = 44  ;;  %v397_v4 = vsel (!%p1421_p10), %vm392_vm2, %v1572_v2, 0  ;;  %v1573_v5 = vld [vmem:[%s1740_s9] sm:$0xff] (!%p1421_p10)   ;;  %v445_v8 = vsub.s32 (!%p1421_p10), 0, %v444_v7  ;;  %s1671_s20 = smov (!%p1421_p10), 112  }
  0x22   : > { %1470 = vmatpush3.bf16.xpose.msra.mxu0 (!%p1421_p10), %v397_v4  ;;  %v375_v12 = vmul.f32 (!%p1421_p10), 1e+09, %v1422_v11  ;;  %v1574_v25 = vld [vmem:[%s1745_s12] sm:$0xff] (!%p1421_p10)   ;;  %s1672_s21 = smov (!%p1421_p10), 104   ;;  %s1676_s22 = smov (!%p1421_p10), 8  }
  0x23   : > { %1487 = vmatprep.subr.bf16.mxu0 (!%p1421_p10), %v1667_v3  ;;  %v1770_v10 = vrot.slane (!%p1421_p10), %v373_v9, %v445_v8  ;;  %v1575_v34 = vld [vmem:[%s1740_s9] sm:$0xff] (!%p1421_p10)   ;;  %s1677_s23 = smov (!%p1421_p10), 16   ;;  %s1678_s26 = smov (!%p1421_p10), 24  }
  0x24   : > { %v1772_v13 = vrot.slane (!%p1421_p10), %v375_v12, %v445_v8  ;;  %v1576_v35 = vld [vmem:[%s1745_s12] sm:$0xff] (!%p1421_p10)  }
  0x25   : > { %v1580_v36 = vld [vmem:[%s1750_s15] sm:$0xff] (!%p1421_p10)  }
  0x26   : > { %1476 = vmatpush3.bf16.msra.mxu1 (!%p1421_p10), %v1580_v36  ;;  %v1577_v37 = vld [vmem:[%s1740_s9] sm:$0xff] (!%p1421_p10)  }
  0x27   : > { %1481 = vmatprep.subr.bf16.mxu1 (!%p1421_p10), %v1667_v3  ;;  %v1578_v38 = vld [vmem:[%s1745_s12] sm:$0xff] (!%p1421_p10)  }
  0x28   : > { %v1579_v39 = vld [vmem:[%s1740_s9] sm:$0xff]  }
  0x29   : > { %1472 = vmatmul.mubr.msk.bf16.vlgmr.msra.gmra.mrb[0].mxu0 %vm392_vm2, %v1573_v5 }
  0x2a   : > { %1489 = vmatprep.mubr.msk.bf16.mxu0 %vm1668_vm3, %v1667_v3 }
  0xfc   : > { %v433_v14 = vpop.f32.mrb[0].mxu0 }
  0xfd   : > { %v440_v15 = vmul.f32 0.35355338, %v433_v14  ;;  %v1473_v16 = vpop.f32.mrb[1].mxu0 }
  0xfe   : > { %v436_v17 = vpop.f32.mrb[2].mxu0 }
  0xff   : > { %v441_v18 = vmul.f32 0.35355338, %v436_v17  ;;  %v1474_v19 = vpop.f32.mrb[3].mxu0  ;;  %v448_v20 = vadd.f32 %v1772_v13, %v440_v15 }
 0x101   : > { %v457_v21 = vsel %vm456_vm4, %v448_v20, -inf  ;;  %v449_v22 = vadd.f32 %v1772_v13, %v441_v18 }
 0x102   : > { %458 = vmax.xlane.f32.xlu0 %v457_v21 }
 0x103   : > { %v460_v23 = vsel %vm456_vm4, %v449_v22, -inf }
 0x106   : > { %461 = vmax.xlane.f32.xlu0 %v460_v23 }
 0x11c   : > { %595 = vrot.lane.b32.xlu0 %v1574_v25, %s1670_s19 }
 0x18f   : > { %v459_v27 = vpop.xlane.xlu0 %458 }
 0x190   : > { %v1784_v28 = vmax.f32 %v1781_v26, %v459_v27 }
 0x192   : > { %v465_v30 = vsub.f32 %v1781_v26, %v1784_v28  ;;  %575 = vst.msk [vmem:[#allocation2] sm:$0xff] %vm505_vm5, %v1784_v28  ;;  %473 = vperm.xlu1 %1560, %v1784_v28  }
 0x193   : > { %v462_v31 = vpop.xlane.xlu0 %461 }
 0x194   : > { %v1794_v32 = vmax.f32 %v1786_v29, %v462_v31 }
 0x196   : > { %v466_v33 = vsub.f32 %v1786_v29, %v1794_v32  ;;  %576 = vst.msk [vmem:[#allocation2 + $0x8] sm:$0xff] %vm505_vm5, %v1794_v32  ;;  %478 = vperm.xlu1 %1560, %v1794_v32  }
 0x197   : > { %v596_v48 = vpop.permute.xlu0 %595 }
 0x198   : > { %v601_v52 = vsel %vm392_vm2, %v596_v48, 0  ;;  %v469_v26 = vmul.f32 1.442695, %v466_v33 }
 0x19a   : > { %588 = vrot.lane.b32.xlu1 %v1575_v34, %s1670_s19 }
 0x19e   : > { %797 = vrot.lane.b32.xlu1 %v1576_v35, %s1671_s20 }
 0x1a2   : > { %790 = vrot.lane.b32.xlu1 %v1577_v37, %s1671_s20 }
 0x1a6   : > { %999 = vrot.lane.b32.xlu1 %v1578_v38, %s1672_s21 }
 0x1aa   : > { %992 = vrot.lane.b32.xlu1 %v1579_v39, %s1672_s21  ;;  %v1673_v39 = vmov 1  }
 0x1ab   : > { %1561 = vset.pattern.permute.xlu0 %v1673_v39  ;;  %1562 = vset.pattern.permute.xlu1 %v1673_v39 }
 0x211   : > { %v474_v40 = vpop.permute.xlu1 %473 }
 0x212   : > { %v481_v41 = vsub.f32 %v448_v20, %v474_v40 }
 0x214   : > { %v483_v42 = vmul.f32 1.442695, %v481_v41  ;;  %v1872_v41 = vld [vmem:[#allocation2] sm:$0xff] }
 0x215   : > { %v479_v43 = vpop.permute.xlu1 %478 }
 0x216   : > { %v482_v44 = vsub.f32 %v449_v22, %v479_v43  ;;  %1584 = vpow2.f32 %v483_v42 }
 0x218   : > { %v485_v45 = vmul.f32 1.442695, %v482_v44 }
 0x219   : > { %v589_v49 = vpop.permute.xlu1 %588 }
 0x21a   : > { %1586 = vpow2.f32 %v485_v45 }
 0x21d   : > { %v798_v54 = vpop.permute.xlu1 %797 }
 0x21e   : > { %v803_v56 = vsel %vm392_vm2, %v798_v54, 0 }
 0x220   : > { %v1585_v46 = vpop.eup %1584 }
 0x221   : > { %v1814_v50 = vmul.f32 %v1585_v46, %v1770_v10  ;;  %v791_v55 = vpop.permute.xlu1 %790 }
 0x224   : > { %v1587_v47 = vpop.eup %1586 }
 0x225   : > { %v1817_v51 = vmul.f32 %v1587_v47, %v1770_v10  ;;  %v1000_v57 = vpop.permute.xlu1 %999  ;;  %v1581_v47 = vld [vmem:[%s1750_s15] sm:$0xff]  }
 0x226   : > { %v1005_v58 = vsel %vm392_vm2, %v1000_v57, 0 }
 0x227   : > { %v520_v53 = vpack.c.bf16 %v1817_v51, %v1814_v50 }
 0x229   : > { %1478 = vmatmul.mubr.msk.bf16.vlgmr.msra.gmra.mrb[0].mxu1 %vm456_vm4, %v520_v53  ;;  %v993_v59 = vpop.permute.xlu1 %992 }
 0x22a   : > { %1482 = vmatpush3.bf16.xpose.msra.mxu1 %v601_v52  ;;  %1483 = vmatprep.mubr.msk.bf16.mxu1 %vm1668_vm3, %v1667_v3  ;;  %v1674_v52 = vmov 2  }
 0x22b   : > { %1493 = vmatprep.subr.bf16.mxu1 %v1667_v3 }
 0x231   : > { %1484 = vmatmul.mubr.msk.bf16.vlgmr.msra.gmra.mrb[4].mxu1 %vm392_vm2, %v589_v49 }
 0x232   : > { %1494 = vmatpush3.bf16.xpose.msra.mxu1 %v803_v56  ;;  %1495 = vmatprep.mubr.msk.bf16.mxu1 %vm1668_vm3, %v1667_v3 }
 0x233   : > { %1505 = vmatprep.subr.bf16.mxu1 %v1667_v3 }
 0x239   : > { %1496 = vmatmul.mubr.msk.bf16.vlgmr.msra.gmra.mrb[8].mxu1 %vm392_vm2, %v791_v55 }
 0x23a   : > { %1506 = vmatpush3.bf16.xpose.msra.mxu1 %v1005_v58  ;;  %1507 = vmatprep.mubr.msk.bf16.mxu1 %vm1668_vm3, %v1667_v3 }
 0x241   : > { %1508 = vmatmul.mubr.msk.bf16.vlgmr.msra.gmra.mrb[12].mxu1 %vm392_vm2, %v993_v59  ;;  %v1582_v59 = vld [vmem:[%s1750_s15] sm:$0xff]  }
 0x2fc   : > { %v1836_v60 = vpop.f32.mrb[0].mxu1 }
 0x2fd   : > { %v1479_v61 = vpop.f32.mrb[1].mxu1 }
 0x2fe   : > { %v1838_v62 = vpop.f32.mrb[2].mxu1 }
 0x2ff   : > { %v1480_v63 = vpop.f32.mrb[3].mxu1 }
 0x304   : > { %v637_v0 = vpop.f32.mrb[4].mxu1 }
 0x305   : > { %v644_v1 = vmul.f32 0.35355338, %v637_v0  ;;  %v1485_v2 = vpop.f32.mrb[5].mxu1 }
 0x306   : > { %v640_v4 = vpop.f32.mrb[6].mxu1 }
 0x307   : > { %v645_v5 = vmul.f32 0.35355338, %v640_v4  ;;  %v1486_v6 = vpop.f32.mrb[7].mxu1  ;;  %v1841_v7 = vadd.f32 %v644_v1, %v1772_v13  ;;  %v1675_v4 = vmov 3  }
 0x309   : > { %v654_v8 = vsel %vm456_vm4, %v1841_v7, -inf  ;;  %v1846_v9 = vadd.f32 %v645_v5, %v1772_v13 }
 0x30a   : > { %655 = vmax.xlane.f32.xlu1 %v654_v8 }
 0x30b   : > { %v657_v11 = vsel %vm456_vm4, %v1846_v9, -inf }
 0x30c   : > { %658 = vmax.xlane.f32.xlu0 %v657_v11  ;;  %v839_v12 = vpop.f32.mrb[8].mxu1  ;;  %v1583_v11 = vld [vmem:[%s1750_s15] sm:$0xff]  }
 0x30d   : > { %v846_v14 = vmul.f32 0.35355338, %v839_v12  ;;  %v1497_v15 = vpop.f32.mrb[9].mxu1  ;;  %v500_v12 = vsel %vm456_vm4, %v1817_v51, 0.0 }
 0x30e   : > { %v842_v16 = vpop.f32.mrb[10].mxu1 }
 0x30f   : > { %v847_v17 = vmul.f32 0.35355338, %v842_v16  ;;  %v1498_v18 = vpop.f32.mrb[11].mxu1  ;;  %v1851_v19 = vadd.f32 %v846_v14, %v1772_v13  ;;  %v467_v14 = vmul.f32 1.442695, %v465_v30 }
 0x311   : > { %v856_v20 = vsel %vm456_vm4, %v1851_v19, -inf  ;;  %v1856_v21 = vadd.f32 %v847_v17, %v1772_v13  ;;  %1588 = vpow2.f32 %v467_v14 }
 0x312   : > { %857 = vmax.xlane.f32.xlu0 %v856_v20 }
 0x313   : > { %v859_v22 = vsel %vm456_vm4, %v1856_v21, -inf }
 0x314   : > { %860 = vmax.xlane.f32.xlu1 %v859_v22  ;;  %v1041_v23 = vpop.f32.mrb[12].mxu1 }
 0x315   : > { %v1048_v25 = vmul.f32 0.35355338, %v1041_v23  ;;  %v1509_v27 = vpop.f32.mrb[13].mxu1 }
 0x316   : > { %v1044_v31 = vpop.f32.mrb[14].mxu1 }
 0x317   : > { %v1049_v34 = vmul.f32 0.35355338, %v1044_v31  ;;  %v1861_v35 = vadd.f32 %v1048_v25, %v1772_v13  ;;  %v1510_v36 = vpop.f32.mrb[15].mxu1 }
 0x319   : > { %v1058_v37 = vsel %vm456_vm4, %v1861_v35, -inf  ;;  %v1866_v38 = vadd.f32 %v1049_v34, %v1772_v13  ;;  %v1877_v13 = vld [vmem:[#allocation2 + $0x8] sm:$0xff] }
 0x31a   : > { %1059 = vmax.xlane.f32.xlu0 %v1058_v37 }
 0x31b   : > { %v1061_v40 = vsel %vm456_vm4, %v1866_v38, -inf  ;;  %v1923_v17 = vpop.eup %1588 }
 0x31c   : > { %1062 = vmax.xlane.f32.xlu1 %v1061_v40 }
 0x397   : > { %v656_v42 = vpop.xlane.xlu1 %655 }
 0x398   : > { %v1875_v43 = vmax.f32 %v1872_v41, %v656_v42 }
 0x399   : > { %v659_v44 = vpop.xlane.xlu0 %658 }
 0x39a   : > { %v662_v45 = vsub.f32 %v1872_v41, %v1875_v43  ;;  %777 = vst.msk [vmem:[#allocation2] sm:$0xff] %vm696_vm6, %v1875_v43  ;;  %v661_v46 = vmax.f32 %v1877_v13, %v659_v44  ;;  %670 = vperm.xlu0 %1561, %v1875_v43  }
 0x39c   : > { %v663_v48 = vsub.f32 %v1877_v13, %v661_v46  ;;  %778 = vst.msk [vmem:[#allocation2 + $0x8] sm:$0xff] %vm696_vm6, %v661_v46  ;;  %675 = vperm.xlu1 %1562, %v661_v46   ;;  %v664_v28 = vmul.f32 1.442695, %v662_v45 }
 0x39e   : > { %1121 = vrot.lane.b32.xlu0 %v1581_v47, %s1672_s21  ;;  %v666_v30 = vmul.f32 1.442695, %v663_v48 }
 0x39f   : > { %v858_v49 = vpop.xlane.xlu0 %857  ;;  %1565 = vset.pattern.permute.xlu0 %v1669_v24 }
 0x3a0   : > { %1563 = vset.pattern.permute.xlu1 %v1674_v52 }
 0x3a1   : > { %v850_v53 = vld [vmem:[#allocation2] sm:$0xff]  ;;  %v861_v56 = vpop.xlane.xlu1 %860 }
 0x3a2   : > { %v862_v54 = vmax.f32 %v850_v53, %v858_v49 }
 0x3a3   : > { %v851_v55 = vld [vmem:[#allocation2 + $0x8] sm:$0xff] }
 0x3a4   : > { %v864_v57 = vsub.f32 %v850_v53, %v862_v54  ;;  %979 = vst.msk [vmem:[#allocation2] sm:$0xff] %vm898_vm7, %v862_v54  ;;  %v863_v58 = vmax.f32 %v851_v55, %v861_v56  ;;  %872 = vperm.xlu1 %1563, %v862_v54  }
 0x3a6   : > { %980 = vst.msk [vmem:[#allocation2 + $0x8] sm:$0xff] %vm898_vm7, %v863_v58  ;;  %v865_v15 = vsub.f32 %v851_v55, %v863_v58  ;;  %v866_v20 = vmul.f32 1.442695, %v864_v57 }
 0x3a7   : > { %v1060_v61 = vpop.xlane.xlu0 %1059 }
 0x3a8   : > { %877 = vperm.xlu1 %1563, %v863_v58   ;;  %v868_v16 = vmul.f32 1.442695, %v865_v15  ;;  %v453_v15 = vld [vmem:[#allocation3 + $0x8] sm:$0xff] }
 0x3a9   : > { %v1063_v0 = vpop.xlane.xlu1 %1062 }
 0x3aa   : > { %1590 = vpow2.f32 %v868_v16 }
 0x3ab   : > { %v1894_v63 = vld [vmem:[#allocation2] sm:$0xff]  ;;  %1592 = vpow2.f32 %v469_v26 }
 0x3ac   : > { %v1897_v1 = vmax.f32 %v1894_v63, %v1060_v61  ;;  %717 = vrot.lane.b32.xlu1 %v1582_v59, %s1670_s19  ;;  %1594 = vpow2.f32 %v664_v28 }
 0x3ad   : > { %v1900_v2 = vld [vmem:[#allocation2 + $0x8] sm:$0xff]  ;;  %1564 = vset.pattern.permute.xlu1 %v1675_v4  ;;  %1596 = vpow2.f32 %v666_v30 }
 0x3ae   : > { %v1066_v5 = vsub.f32 %v1894_v63, %v1897_v1  ;;  %1181 = vst.msk [vmem:[#allocation2] sm:$0xff] %vm1100_vm8, %v1897_v1  ;;  %v1907_v6 = vmax.f32 %v1900_v2, %v1063_v0  ;;  %1598 = vpow2.f32 %v866_v20 }
 0x3b0   : > { %v1067_v8 = vsub.f32 %v1900_v2, %v1907_v6  ;;  %1182 = vst.msk [vmem:[#allocation2 + $0x8] sm:$0xff] %vm1100_vm8, %v1907_v6  ;;  %1074 = vperm.xlu1 %1564, %v1897_v1  }
 0x3b4   : > { %1079 = vperm.xlu1 %1564, %v1907_v6   ;;  %v1926_v18 = vpop.eup %1590 }
 0x3b5   : > { %v1935_v51 = vpop.eup %1592 }
 0x3b6   : > { %v1938_v22 = vpop.eup %1594  ;;  %v496_v16 = vmul.f32 %v1935_v51, %v453_v15 }
 0x3b8   : > { %919 = vrot.lane.b32.xlu1 %v1583_v11, %s1671_s20 }
 0x3b9   : > { %1566 = vset.pattern.permute.xlu1 %v1669_v24  ;;  %v497_v24 = vsel %vm456_vm4, %v1814_v50, 0.0  ;;  %v1942_v50 = vpop.eup %1596 }
 0x3ba   : > { %v1945_v29 = vpop.eup %1598 }
 0x3bd   : > { %501 = vadd.xlane.f32.xlu0 %v500_v12 }
 0x3d3   : > { %510 = vperm.xlu0 %1565, %v1923_v17  }
 0x3d7   : > { %1569 = vset.pattern.permute.xlu0 %v1674_v52 }
 0x3d8   : > { %908 = vperm.xlu0 %1569, %v1926_v18  }
 0x3dc   : > { %498 = vadd.xlane.f32.xlu1 %v497_v24  ;;  %1571 = vset.pattern.permute.xlu0 %v1675_v4 }
 0x3ed   : > { %515 = vperm.xlu1 %1566, %v1935_v51  }
 0x3f1   : > { %1567 = vset.pattern.permute.xlu1 %v1673_v39 }
 0x3f2   : > { %701 = vperm.xlu1 %1567, %v1938_v22  }
 0x3f6   : > { %706 = vperm.xlu1 %1567, %v1942_v50  }
 0x3fa   : > { %1568 = vset.pattern.permute.xlu1 %v1674_v52 }
 0x3fb   : > { %903 = vperm.xlu1 %1568, %v1945_v29  }
 0x3ff   : > { %1570 = vset.pattern.permute.xlu1 %v1675_v4 }
 0x419   : > { %v671_v32 = vpop.permute.xlu0 %670 }
 0x41a   : > { %v678_v33 = vsub.f32 %v1841_v7, %v671_v32 }
 0x41b   : > { %v676_v23 = vpop.permute.xlu1 %675 }
 0x41c   : > { %v680_v25 = vmul.f32 1.442695, %v678_v33  ;;  %v679_v27 = vsub.f32 %v1846_v9, %v676_v23 }
 0x41d   : > { %v1122_v61 = vpop.permute.xlu0 %1121 }
 0x41e   : > { %1600 = vpow2.f32 %v680_v25  ;;  %v682_v31 = vmul.f32 1.442695, %v679_v27  ;;  %v455_v25 = vld [vmem:[#allocation4 + $0x8] sm:$0xff] }
 0x420   : > { %1602 = vpow2.f32 %v682_v31 }
 0x423   : > { %v873_v34 = vpop.permute.xlu1 %872 }
 0x424   : > { %v880_v36 = vsub.f32 %v1851_v19, %v873_v34 }
 0x426   : > { %v882_v37 = vmul.f32 1.442695, %v880_v36 }
 0x427   : > { %v878_v39 = vpop.permute.xlu1 %877 }
 0x428   : > { %v1601_v40 = vpop.eup %1600  ;;  %1604 = vpow2.f32 %v882_v37  ;;  %v881_v41 = vsub.f32 %v1856_v21, %v878_v39 }
 0x429   : > { %v684_v42 = vmul.f32 %v1601_v40, %v1770_v10 }
 0x42a   : > { %v1603_v43 = vpop.eup %1602  ;;  %v884_v7 = vmul.f32 1.442695, %v881_v41 }
 0x42b   : > { %v718_v13 = vpop.permute.xlu1 %717  ;;  %v688_v44 = vsel %vm456_vm4, %v684_v42, 0.0  ;;  %v685_v9 = vmul.f32 %v1603_v43, %v1770_v10 }
 0x42c   : > { %1606 = vpow2.f32 %v884_v7  ;;  %689 = vadd.xlane.f32.xlu1 %v688_v44  ;;  %1488 = vmatpush3.bf16.msra.mxu0 %v718_v13  ;;  %v1068_v13 = vmul.f32 1.442695, %v1066_v5 }
 0x42d   : > { %v691_v19 = vsel %vm456_vm4, %v685_v9, 0.0  ;;  %v711_v45 = vpack.c.bf16 %v685_v9, %v684_v42  ;;  %1499 = vmatprep.subr.bf16.mxu0 %v1667_v3 }
 0x42e   : > { %692 = vadd.xlane.f32.xlu0 %v691_v19 }
 0x42f   : > { %1490 = vmatmul.mubr.msk.bf16.vlgmr.msra.gmra.mrb[4].mxu0 %vm456_vm4, %v711_v45  ;;  %v1075_v21 = vpop.permute.xlu1 %1074 }
 0x430   : > { %v1082_v46 = vsub.f32 %v1861_v35, %v1075_v21  ;;  %1501 = vmatprep.mubr.msk.bf16.mxu0 %vm1668_vm3, %v1667_v3 }
 0x432   : > { %v1605_v47 = vpop.eup %1604  ;;  %v1084_v48 = vmul.f32 1.442695, %v1082_v46 }
 0x433   : > { %v1080_v49 = vpop.permute.xlu1 %1079  ;;  %v886_v52 = vmul.f32 %v1605_v47, %v1770_v10 }
 0x434   : > { %1608 = vpow2.f32 %v1084_v48  ;;  %v1083_v53 = vsub.f32 %v1866_v38, %v1080_v49 }
 0x435   : > { %v890_v54 = vsel %vm456_vm4, %v886_v52, 0.0 }
 0x436   : > { %v1607_v55 = vpop.eup %1606  ;;  %v1086_v56 = vmul.f32 1.442695, %v1083_v53  ;;  %891 = vadd.xlane.f32.xlu1 %v890_v54 }
 0x437   : > { %v920_v57 = vpop.permute.xlu1 %919  ;;  %v887_v58 = vmul.f32 %v1607_v55, %v1770_v10 }
 0x438   : > { %1610 = vpow2.f32 %v1086_v56  ;;  %1500 = vmatpush3.bf16.msra.mxu0 %v920_v57 }
 0x439   : > { %v893_v35 = vsel %vm456_vm4, %v887_v58, 0.0  ;;  %v913_v59 = vpack.c.bf16 %v887_v58, %v886_v52  ;;  %1511 = vmatprep.subr.bf16.mxu0 %v1667_v3  ;;  %1612 = vpow2.f32 %v1068_v13 }
 0x43a   : > { %894 = vadd.xlane.f32.xlu0 %v893_v35 }
 0x43b   : > { %1502 = vmatmul.mubr.msk.bf16.vlgmr.msra.gmra.mrb[8].mxu0 %vm456_vm4, %v913_v59 }
 0x43c   : > { %1512 = vmatpush3.bf16.msra.mxu0 %v1122_v61  ;;  %1513 = vmatprep.mubr.msk.bf16.mxu0 %vm1668_vm3, %v1667_v3  ;;  %v454_v3 = vld [vmem:[#allocation4] sm:$0xff] }
 0x43e   : > { %v1609_v38 = vpop.eup %1608 }
 0x43f   : > { %v1088_v0 = vmul.f32 %v1609_v38, %v1770_v10 }
 0x441   : > { %v1092_v4 = vsel %vm456_vm4, %v1088_v0, 0.0 }
 0x442   : > { %v1611_v11 = vpop.eup %1610  ;;  %1093 = vadd.xlane.f32.xlu1 %v1092_v4 }
 0x443   : > { %v1974_v12 = vmul.f32 %v1611_v11, %v1770_v10  ;;  %v452_v10 = vld [vmem:[#allocation3] sm:$0xff]  ;;  %v1613_v47 = vpop.eup %1612 }
 0x444   : > { %v495_v32 = vmul.f32 %v1923_v17, %v452_v10 }
 0x445   : > { %v1115_v14 = vpack.c.bf16 %v1974_v12, %v1088_v0  ;;  %v1095_v2 = vsel %vm456_vm4, %v1974_v12, 0.0 }
 0x447   : > { %1514 = vmatmul.mubr.msk.bf16.vlgmr.msra.gmra.mrb[12].mxu0 %vm456_vm4, %v1115_v14 }
 0x44a   : > { %v502_v24 = vpop.xlane.xlu0 %501 }
 0x44b   : > { %v504_v26 = vadd.f32 %v502_v24, %v496_v16 }
 0x44d   : > { %507 = vst.msk [vmem:[#allocation3 + $0x8] sm:$0xff] %vm505_vm5, %v504_v26 }
 0x452   : > { %v511_v28 = vpop.permute.xlu0 %510 }
 0x453   : > { %v518_v30 = vmul.f32 %v511_v28, %v454_v3 }
 0x454   : > { %v651_v17 = vld [vmem:[#allocation3 + $0x8] sm:$0xff] }
 0x455   : > { %v571_v20 = vadd.f32 %v1836_v60, %v518_v30  ;;  %v687_v43 = vmul.f32 %v1942_v50, %v651_v17 }
 0x457   : > { %573 = vst.msk [vmem:[#allocation4] sm:$0xff] %vm392_vm2, %v571_v20  ;;  %v1990_v39 = vpop.permute.xlu0 %908 }
 0x45e   : > { %v652_v6 = vld [vmem:[#allocation4] sm:$0xff] }
 0x469   : > { %v499_v33 = vpop.xlane.xlu1 %498 }
 0x46a   : > { %v503_v23 = vadd.f32 %v499_v33, %v495_v32 }
 0x46c   : > { %506 = vst.msk [vmem:[#allocation3] sm:$0xff] %vm505_vm5, %v503_v23 }
 0x46d   : > { %v516_v51 = vpop.permute.xlu1 %515 }
 0x46e   : > { %v519_v27 = vmul.f32 %v516_v51, %v455_v25 }
 0x470   : > { %v572_v31 = vadd.f32 %v1838_v62, %v519_v27 }
 0x471   : > { %v702_v34 = vpop.permute.xlu1 %701 }
 0x472   : > { %574 = vst.msk [vmem:[#allocation4 + $0x8] sm:$0xff] %vm392_vm2, %v572_v31  ;;  %v709_v0 = vmul.f32 %v702_v34, %v652_v6 }
 0x473   : > { %v650_v37 = vld [vmem:[#allocation3] sm:$0xff] }
 0x474   : > { %v686_v40 = vmul.f32 %v1938_v22, %v650_v37 }
 0x475   : > { %v1986_v36 = vpop.permute.xlu1 %706 }
 0x47a   : > { %v1988_v60 = vpop.permute.xlu1 %903 }
 0x4b9   : > { %v690_v41 = vpop.xlane.xlu1 %689 }
 0x4ba   : > { %v694_v42 = vadd.f32 %v690_v41, %v686_v40 }
 0x4bb   : > { %v693_v7 = vpop.xlane.xlu0 %692 }
 0x4bc   : > { %697 = vst.msk [vmem:[#allocation3] sm:$0xff] %vm696_vm6, %v694_v42  ;;  %v695_v62 = vadd.f32 %v693_v7, %v687_v43 }
 0x4be   : > { %698 = vst.msk [vmem:[#allocation3 + $0x8] sm:$0xff] %vm696_vm6, %v695_v62 }
 0x4c3   : > { %v852_v44 = vld [vmem:[#allocation3] sm:$0xff]  ;;  %v892_v19 = vpop.xlane.xlu1 %891 }
 0x4c4   : > { %v888_v9 = vmul.f32 %v1945_v29, %v852_v44 }
 0x4c5   : > { %v853_v22 = vld [vmem:[#allocation3 + $0x8] sm:$0xff] }
 0x4c6   : > { %v896_v45 = vadd.f32 %v892_v19, %v888_v9  ;;  %v889_v21 = vmul.f32 %v1926_v18, %v853_v22  ;;  %v1070_v18 = vmul.f32 1.442695, %v1067_v8  ;;  %v653_v8 = vld [vmem:[#allocation4 + $0x8] sm:$0xff] }
 0x4c7   : > { %v895_v50 = vpop.xlane.xlu0 %894  ;;  %v710_v11 = vmul.f32 %v1986_v36, %v653_v8 }
 0x4c8   : > { %899 = vst.msk [vmem:[#allocation3] sm:$0xff] %vm898_vm7, %v896_v45  ;;  %v897_v46 = vadd.f32 %v895_v50, %v889_v21  ;;  %1614 = vpow2.f32 %v1070_v18 }
 0x4ca   : > { %900 = vst.msk [vmem:[#allocation3 + $0x8] sm:$0xff] %vm898_vm7, %v897_v46 }
 0x4cf   : > { %v1054_v48 = vld [vmem:[#allocation3] sm:$0xff]  ;;  %v1094_v63 = vpop.xlane.xlu1 %1093 }
 0x4d0   : > { %v1090_v49 = vmul.f32 %v1613_v47, %v1054_v48 }
 0x4d1   : > { %v1055_v37 = vld [vmem:[#allocation3 + $0x8] sm:$0xff] }
 0x4d2   : > { %v1098_v1 = vadd.f32 %v1094_v63, %v1090_v49  ;;  %v1615_v58 = vpop.eup %1614 }
 0x4d3   : > { %v1091_v17 = vmul.f32 %v1615_v58, %v1055_v37 }
 0x4d4   : > { %1101 = vst.msk [vmem:[#allocation3] sm:$0xff] %vm1100_vm8, %v1098_v1 }
 0x502   : > { %v757_v5 = vpop.f32.mrb[4].mxu0 }
 0x503   : > { %766 = vrot.lane.b32.xlu0 %v757_v5, %s1676_s22  ;;  %v1491_v29 = vpop.f32.mrb[5].mxu0 }
 0x504   : > { %v760_v52 = vpop.f32.mrb[6].mxu0 }
 0x505   : > { %v1492_v53 = vpop.f32.mrb[7].mxu0  ;;  %768 = vrot.lane.b32.xlu1 %v760_v52, %s1676_s22 }
 0x509   : > { %1105 = vperm.xlu1 %1570, %v1613_v47  }
 0x50e   : > { %v959_v54 = vpop.f32.mrb[8].mxu0 }
 0x50f   : > { %968 = vrot.lane.b32.xlu1 %v959_v54, %s1677_s23  ;;  %v1503_v55 = vpop.f32.mrb[9].mxu0 }
 0x510   : > { %v962_v56 = vpop.f32.mrb[10].mxu0 }
 0x511   : > { %v1504_v57 = vpop.f32.mrb[11].mxu0 }
 0x513   : > { %970 = vrot.lane.b32.xlu1 %v962_v56, %s1677_s23 }
 0x517   : > { %1110 = vperm.xlu1 %1570, %v1615_v58  }
 0x51a   : > { %v1161_v35 = vpop.f32.mrb[12].mxu0 }
 0x51b   : > { %1170 = vrot.lane.b32.xlu1 %v1161_v35, %s1678_s26  ;;  %v1515_v59 = vpop.f32.mrb[13].mxu0 }
 0x51c   : > { %v1164_v61 = vpop.f32.mrb[14].mxu0 }
 0x51d   : > { %v1516_v38 = vpop.f32.mrb[15].mxu0 }
 0x51f   : > { %1172 = vrot.lane.b32.xlu1 %v1164_v61, %s1678_s26 }
 0x522   : > { %1096 = vadd.xlane.f32.xlu0 %v1095_v2 }
 0x575   : > { %v767_v4 = vpop.permute.xlu0 %766 }
 0x576   : > { %v772_v14 = vadd.f32 %v767_v4, %v709_v0 }
 0x577   : > { %v769_v15 = vpop.permute.xlu1 %768 }
 0x578   : > { %775 = vst.msk [vmem:[#allocation4] sm:$0xff] %vm774_vm9, %v772_v14  ;;  %v773_v16 = vadd.f32 %v769_v15, %v710_v11 }
 0x57a   : > { %776 = vst.msk [vmem:[#allocation4 + $0x8] sm:$0xff] %vm774_vm9, %v773_v16 }
 0x57f   : > { %v854_v26 = vld [vmem:[#allocation4] sm:$0xff] }
 0x580   : > { %v911_v3 = vmul.f32 %v1988_v60, %v854_v26 }
 0x581   : > { %v855_v12 = vld [vmem:[#allocation4 + $0x8] sm:$0xff] }
 0x582   : > { %v912_v20 = vmul.f32 %v1990_v39, %v855_v12 }
 0x588   : > { %v1106_v24 = vpop.permute.xlu1 %1105 }
 0x58c   : > { %v969_v28 = vpop.permute.xlu1 %968 }
 0x58d   : > { %v974_v30 = vadd.f32 %v969_v28, %v911_v3 }
 0x58f   : > { %977 = vst.msk [vmem:[#allocation4] sm:$0xff] %vm976_vm10, %v974_v30 }
 0x590   : > { %v971_v10 = vpop.permute.xlu1 %970 }
 0x591   : > { %v975_v32 = vadd.f32 %v971_v10, %v912_v20 }
 0x593   : > { %978 = vst.msk [vmem:[#allocation4 + $0x8] sm:$0xff] %vm976_vm10, %v975_v32 }
 0x596   : > { %v1111_v33 = vpop.permute.xlu1 %1110  ;;  %v1056_v23 = vld [vmem:[#allocation4] sm:$0xff] }
 0x597   : > { %v1113_v25 = vmul.f32 %v1106_v24, %v1056_v23 }
 0x59a   : > { %v1057_v51 = vld [vmem:[#allocation4 + $0x8] sm:$0xff]  ;;  %v1171_v27 = vpop.permute.xlu1 %1170 }
 0x59b   : > { %v1176_v31 = vadd.f32 %v1171_v27, %v1113_v25  ;;  %v1114_v34 = vmul.f32 %v1111_v33, %v1057_v51 }
 0x59d   : > { %1179 = vst.msk [vmem:[#allocation4] sm:$0xff] %vm1178_vm11, %v1176_v31 }
 0x59e   : > { %v1173_v36 = vpop.permute.xlu1 %1172 }
 0x59f   : > { %v1177_v60 = vadd.f32 %v1173_v36, %v1114_v34 }
 0x5a1   : > { %1180 = vst.msk [vmem:[#allocation4 + $0x8] sm:$0xff] %vm1178_vm11, %v1177_v60 }
 0x5af   : > { %v1097_v40 = vpop.xlane.xlu0 %1096 }
 0x5b0   : > { %v1099_v41 = vadd.f32 %v1097_v40, %v1091_v17 }
 0x5b2   : > { %1102 = vst.msk [vmem:[#allocation3 + $0x8] sm:$0xff] %vm1100_vm8, %v1099_v41 }
 0x5b3 PF: > { %v1186_v39 = vld [vmem:[#allocation3] sm:$0xff]  ;;  %v1679_v43 = vmov 0   ;;  %v1680_v7 = vmov 1   ;;  %v1681_v19 = vmov 2   ;;  %v1682_v22 = vmov 3   ;;  %v1194_v45 = vld [vmem:[#allocation4] sm:$0xff] }
 0x5b4   : > { %1616 = vset.pattern.permute.xlu0 %v1679_v43  ;;  %vm1188_vm12 = vcmp.eq.f32.partialorder %v1186_v39, 0.0  ;;  %1617 = vset.pattern.permute.xlu1 %v1680_v7  ;;  %vm1208_vm14 = vcmask 64512   ;;  %v1195_v46 = vld [vmem:[#allocation4 + $0x8] sm:$0xff]  ;;  %vm1223_vm15 = vcmask 130112   ;;  %vm1238_vm0 = vcmask 195712  }
 0x5b5   : > { %v1190_v62 = vsel %vm1188_vm12, 1.0, %v1186_v39  ;;  %vm1253_vm1 = vcmask 261312   ;;  %vm1266_vm2 = vcmask 257024  }
 0x5b6   : > { %1622 = vrcp.f32 %v1190_v62 }
 0x5b9   : > { %v1187_v42 = vld [vmem:[#allocation3 + $0x8] sm:$0xff] }
 0x5ba   : > { %vm1189_vm13 = vcmp.eq.f32.partialorder %v1187_v42, 0.0 }
 0x5bb   : > { %v1191_v13 = vsel %vm1189_vm13, 1.0, %v1187_v42 }
 0x5bc   : > { %1624 = vrcp.f32 %v1191_v13 }
 0x5c0   : > { %v1623_v44 = vpop.eup %1622 }
 0x5c1   : > { %1198 = vperm.xlu0 %1616, %v1623_v44   ;;  %1214 = vperm.xlu1 %1617, %v1623_v44  }
 0x5c6   : > { %v1625_v9 = vpop.eup %1624 }
 0x5c7   : > { %1203 = vperm.xlu0 %1616, %v1625_v9   ;;  %1218 = vperm.xlu1 %1617, %v1625_v9  }
 0x5cb   : > { %1618 = vset.pattern.permute.xlu0 %v1681_v19  ;;  %1619 = vset.pattern.permute.xlu1 %v1681_v19 }
 0x5cc   : > { %1229 = vperm.xlu0 %1618, %v1623_v44   ;;  %1233 = vperm.xlu1 %1619, %v1625_v9  }
 0x5d0   : > { %1620 = vset.pattern.permute.xlu1 %v1682_v22  ;;  %1621 = vset.pattern.permute.xlu0 %v1682_v22 }
 0x5d1   : > { %1244 = vperm.xlu1 %1620, %v1623_v44   ;;  %1248 = vperm.xlu0 %1621, %v1625_v9  }
 0x640   : > { %v1199_v21 = vpop.permute.xlu0 %1198  ;;  %v1215_v49 = vpop.permute.xlu1 %1214 }
 0x641   : > { %v1206_v50 = vmul.f32 %v1199_v21, %v1194_v45 }
 0x643   : > { %1209 = vst.msk [vmem:[#allocation4] sm:$0xff] %vm1208_vm14, %v1206_v50 }
 0x646   : > { %v1204_v47 = vpop.permute.xlu0 %1203  ;;  %v1219_v5 = vpop.permute.xlu1 %1218 }
 0x647   : > { %v1207_v48 = vmul.f32 %v1204_v47, %v1195_v46 }
 0x649   : > { %1210 = vst.msk [vmem:[#allocation4 + $0x8] sm:$0xff] %vm1208_vm14, %v1207_v48 }
 0x64a   : > { %v1211_v63 = vld [vmem:[#allocation4] sm:$0xff] }
 0x64b   : > { %v1221_v1 = vmul.f32 %v1215_v49, %v1211_v63  ;;  %v1230_v53 = vpop.permute.xlu0 %1229  ;;  %v1234_v55 = vpop.permute.xlu1 %1233 }
 0x64d   : > { %1224 = vst.msk [vmem:[#allocation4] sm:$0xff] %vm1223_vm15, %v1221_v1 }
 0x650   : > { %v1212_v29 = vld [vmem:[#allocation4 + $0x8] sm:$0xff]  ;;  %v1245_v58 = vpop.permute.xlu1 %1244  ;;  %v1249_v61 = vpop.permute.xlu0 %1248 }
 0x651   : > { %v1222_v52 = vmul.f32 %v1219_v5, %v1212_v29 }
 0x653   : > { %1225 = vst.msk [vmem:[#allocation4 + $0x8] sm:$0xff] %vm1223_vm15, %v1222_v52 }
 0x654   : > { %v1226_v18 = vld [vmem:[#allocation4] sm:$0xff] }
 0x655   : > { %v1236_v54 = vmul.f32 %v1230_v53, %v1226_v18 }
 0x657   : > { %1239 = vst.msk [vmem:[#allocation4] sm:$0xff] %vm1238_vm0, %v1236_v54 }
 0x65a   : > { %v1227_v56 = vld [vmem:[#allocation4 + $0x8] sm:$0xff] }
 0x65b   : > { %v1237_v57 = vmul.f32 %v1234_v55, %v1227_v56 }
 0x65d   : > { %1240 = vst.msk [vmem:[#allocation4 + $0x8] sm:$0xff] %vm1238_vm0, %v1237_v57 }
 0x65e   : > { %v1241_v35 = vld [vmem:[#allocation4] sm:$0xff] }
 0x65f   : > { %v1251_v59 = vmul.f32 %v1245_v58, %v1241_v35 }
 0x661   : > { %1254 = vst.msk [vmem:[#allocation4] sm:$0xff] %vm1253_vm1, %v1251_v59 }
 0x664   : > { %v1242_v38 = vld [vmem:[#allocation4 + $0x8] sm:$0xff] }
 0x665   : > { %v1252_v2 = vmul.f32 %v1249_v61, %v1242_v38 }
 0x667   : > { %1255 = vst.msk [vmem:[#allocation4 + $0x8] sm:$0xff] %vm1253_vm1, %v1252_v2 }
 0x668   : > { %v1256_v6 = vld [vmem:[#allocation4] sm:$0xff] }
 0x669   : > { %v1451_v8 = vpack.c.bf16 %v1256_v6, %v1256_v6 }
 0x66b   : > { %1267 = vst.msk [vmem:[%s1755_s18] sm:$0xf] %vm1266_vm2, %v1451_v8 }
 0x66e   : > { %v1257_v0 = vld [vmem:[#allocation4 + $0x8] sm:$0xff] }
 0x66f   : > { %v1452_v4 = vpack.c.bf16 %v1257_v0, %v1257_v0 }
 0x671   : > { %1268 = vst.msk [vmem:[%s1755_s18 + $0x4] sm:$0xf] %vm1266_vm2, %v1452_v4 }
 0x672 PF: > { %s21_s25 = sadd.s32 1, %s1662_s25   ;;  %s2030_s23 = smov %s1658_s24 }
 0x673   : > { %p18_p11 = scmp.ge.s32.totalorder %s21_s25, 4   ;;  %s2031_s24 = smov %s2033_s0 }
 0x675   :  { %20 = sbr.rel (!%p18_p11) target bundleno = 17 (0x11), region = 87 }

</bundles_post_ra>
